<compile_context>
chip_gen: v5e
topology: v5e:2x2
jax: 0.10.0
libtpu: 0.0.40
codegen_flags: <defaults>
</compile_context>

<pallas_src>
import functools

import jax
import jax.numpy as jnp
from jax.experimental import pallas as pl
from jax.experimental.pallas import tpu as pltpu


def _mlp_kernel(x_ref, w1_ref, b1_ref, w2_ref, b2_ref, o_ref):
    # x_ref:  (TILE_N, D_in)   VMEM, streaming (double-buffered)
    # w1_ref: (D_in, H)        VMEM, resident (constant index_map)
    # b1_ref: (1, H)           VMEM, resident
    # w2_ref: (H, D_out)       VMEM, resident
    # b2_ref: (1, D_out)       VMEM, resident
    # o_ref:  (TILE_N, D_out)  VMEM, streaming
    x = x_ref[...]

    # Linear 1 — MXU on native dtype, f32 accumulation.
    h = jnp.dot(x, w1_ref[...], preferred_element_type=jnp.float32)
    h = h + b1_ref[...].astype(jnp.float32)

    # Softplus(beta=100, threshold=20), f32 (matches PyTorch numerics):
    #   out = x                       if beta * x > threshold
    #       = log1p(exp(beta*x))/beta otherwise
    beta = 100.0
    inv_beta = 1.0 / beta
    threshold = 20.0
    hb = h * beta
    soft = jnp.log1p(jnp.exp(jnp.minimum(hb, threshold))) * inv_beta
    a = jnp.where(hb > threshold, h, soft)

    # Linear 2 — cast activation back to the streaming dtype so bf16 inputs keep
    # the fast single-pass MXU path; accumulate in f32; cast once at the store.
    y = jnp.dot(a.astype(x.dtype), w2_ref[...], preferred_element_type=jnp.float32)
    y = y + b2_ref[...].astype(jnp.float32)
    o_ref[...] = y.astype(o_ref.dtype)


def _round_up(n, m):
    return (n + m - 1) // m * m


def _auto_tile_n(n_rows, d_in, d_out, itemsize):
    # Per-step HBM traffic per row.
    bytes_per_row = (d_in + d_out) * itemsize
    # Keep the two double-buffered streaming tiles under ~8 MiB of VMEM.
    vmem_cap = max(256, ((8 << 20) // (2 * bytes_per_row)) // 8 * 8)
    tile_n = min(8192, vmem_cap)
    # Prefer >= ~8 grid steps (pipelining + megacore) when N is large enough,
    # but never drop below 256 rows (per-step overhead amortisation).
    tile_n = min(tile_n, max(256, _round_up(pl.cdiv(n_rows, 8), 8)))
    # No point tiling beyond N itself (8-row granularity for sublane alignment).
    tile_n = min(tile_n, _round_up(max(n_rows, 8), 8))
    return tile_n


@functools.partial(jax.jit, static_argnames=("tile_n",))
def mlp_col_neighbor(x, w1, b1, w2, b2, *, tile_n=None):
    """x: [N, c_dim + embedding_size_rel] -> [N, c_dim].

    Weights are stored transposed vs. PyTorch ([in, out]); biases are 1-D.
    """
    N, d_in = x.shape
    hidden = w1.shape[1]
    d_out = w2.shape[1]
    assert w1.shape == (d_in, hidden)
    assert w2.shape == (hidden, d_out)
    assert b1.shape == (hidden,)
    assert b2.shape == (d_out,)

    if tile_n is None:
        tile_n = _auto_tile_n(N, d_in, d_out, x.dtype.itemsize)

    b1r = b1.reshape(1, hidden)
    b2r = b2.reshape(1, d_out)

    grid = (pl.cdiv(N, tile_n),)

    out = pl.pallas_call(
        _mlp_kernel,
        out_shape=jax.ShapeDtypeStruct((N, d_out), x.dtype),
        grid_spec=pltpu.PrefetchScalarGridSpec(
            num_scalar_prefetch=0,
            grid=grid,
            in_specs=[
                pl.BlockSpec((tile_n, d_in), lambda i: (i, 0)),
                pl.BlockSpec((d_in, hidden), lambda i: (0, 0)),
                pl.BlockSpec((1, hidden), lambda i: (0, 0)),
                pl.BlockSpec((hidden, d_out), lambda i: (0, 0)),
                pl.BlockSpec((1, d_out), lambda i: (0, 0)),
            ],
            out_specs=pl.BlockSpec((tile_n, d_out), lambda i: (i, 0)),
        ),
        compiler_params=pltpu.CompilerParams(
            dimension_semantics=("parallel",),
        ),
    )(x, w1, b1r, w2, b2r)

    return out


# ---------------------------------------------------------------------------
# Init helpers (match the PyTorch module) and a pure-JAX reference.
# ---------------------------------------------------------------------------

def _xavier_uniform(key, fan_in, fan_out, dtype=jnp.float32):
    # torch.nn.init.xavier_uniform_: U(-a, a), a = sqrt(6 / (fan_in + fan_out)).
    # Returned in [in, out] layout (transposed vs. PyTorch's [out, in]).
    a = (6.0 / (fan_in + fan_out)) ** 0.5
    return jax.random.uniform(key, (fan_in, fan_out), dtype, minval=-a, maxval=a)


def _linear_bias_init(key, fan_in, fan_out, dtype=jnp.float32):
    # nn.Linear default bias init: U(-1/sqrt(fan_in), 1/sqrt(fan_in)).
    bound = 1.0 / (fan_in ** 0.5)
    return jax.random.uniform(key, (fan_out,), dtype, minval=-bound, maxval=bound)


def _reference(x, w1, b1, w2, b2):
    xf = x.astype(jnp.float32)
    w1f, b1f = w1.astype(jnp.float32), b1.astype(jnp.float32)
    w2f, b2f = w2.astype(jnp.float32), b2.astype(jnp.float32)
    h = xf @ w1f + b1f
    hb = 100.0 * h
    a = jnp.where(hb > 20.0,
                  h,
                  jnp.log1p(jnp.exp(jnp.minimum(hb, 20.0))) / 100.0)
    return a @ w2f + b2f


if __name__ == "__main__":
    # Module hyperparameters (small, consistent with the forward pass).
    c_dim = 32
    embedding_size_rel = 32
    hidden_size = 64
    d_in = c_dim + embedding_size_rel

    key = jax.random.PRNGKey(0)
    kx, kw1, kb1, kw2, kb2 = jax.random.split(key, 5)

    w1 = _xavier_uniform(kw1, d_in, hidden_size)
    b1 = _linear_bias_init(kb1, d_in, hidden_size)
    w2 = _xavier_uniform(kw2, hidden_size, c_dim)
    b2 = _linear_bias_init(kb2, hidden_size, c_dim)

    # N not a multiple of the tile -> exercises the masked partial last block.
    N = 1030
    x = jax.random.normal(kx, (N, d_in), jnp.float32)

    out = jax.block_until_ready(mlp_col_neighbor(x, w1, b1, w2, b2))
    ref = _reference(x, w1, b1, w2, b2)

    assert out.shape == (N, c_dim), out.shape
    assert bool(jnp.all(jnp.isfinite(out))), "non-finite output"
    # Tolerance covers possible MXU-vs-XLA f32 matmul precision differences
    # while still catching structural bugs (missing bias, wrong activation,
    # broken boundary masking).
    assert jnp.allclose(out, ref, atol=1e-2, rtol=1e-2), \
        f"mismatch vs reference, max err {jnp.max(jnp.abs(out - ref))}"

    print("KERNEL_OK")
</pallas_src>

<mosaic_0001>
module attributes {stable_mosaic.version = 11 : i64} {
  func.func @_mlp_kernel(%arg0: i32, %arg1: memref<256x64xf32, #tpu.memory_space<vmem>>, %arg2: memref<64x64xf32, #tpu.memory_space<vmem>>, %arg3: memref<1x64xf32, #tpu.memory_space<vmem>>, %arg4: memref<64x32xf32, #tpu.memory_space<vmem>>, %arg5: memref<1x32xf32, #tpu.memory_space<vmem>>, %arg6: memref<256x32xf32, #tpu.memory_space<vmem>>) attributes {dimension_semantics = [#tpu.dimension_semantics<parallel>], iteration_bounds = array<i64: 5>, scalar_prefetch = 0 : i64, scratch_operands = 0 : i64, tpu.core_type = #tpu.core_type<tc>, window_params = [{transform_indices = @transform_0, window_bounds = array<i64: 256, 64>}, {pipeline_mode = #tpu.pipeline_mode<synchronous>, transform_indices = @transform_1, window_bounds = array<i64: 64, 64>}, {pipeline_mode = #tpu.pipeline_mode<synchronous>, transform_indices = @transform_2, window_bounds = array<i64: 1, 64>}, {pipeline_mode = #tpu.pipeline_mode<synchronous>, transform_indices = @transform_3, window_bounds = array<i64: 64, 32>}, {pipeline_mode = #tpu.pipeline_mode<synchronous>, transform_indices = @transform_4, window_bounds = array<i64: 1, 32>}, {transform_indices = @transform_5, window_bounds = array<i64: 256, 32>}]} {
    %c0 = arith.constant 0 : index
    %c0_0 = arith.constant 0 : index
    %0 = vector.load %arg1[%c0, %c0_0] : memref<256x64xf32, #tpu.memory_space<vmem>>, vector<256x64xf32>
    %c0_1 = arith.constant 0 : index
    %c0_2 = arith.constant 0 : index
    %1 = vector.load %arg2[%c0_1, %c0_2] : memref<64x64xf32, #tpu.memory_space<vmem>>, vector<64x64xf32>
    %cst = arith.constant dense<0.000000e+00> : vector<256x64xf32>
    %2 = tpu.matmul %0, %1, %cst {dimension_numbers = #tpu.dot_dimension_numbers<[1], [0], [0], [1], [0, 0, 1, 1], [], []>} : vector<256x64xf32>, vector<64x64xf32>, vector<256x64xf32> -> vector<256x64xf32>
    %c0_3 = arith.constant 0 : index
    %c0_4 = arith.constant 0 : index
    %3 = vector.load %arg3[%c0_3, %c0_4] : memref<1x64xf32, #tpu.memory_space<vmem>>, vector<1x64xf32>
    %4 = vector.broadcast %3 : vector<1x64xf32> to vector<256x64xf32>
    %5 = arith.addf %2, %4 : vector<256x64xf32>
    %cst_5 = arith.constant 1.000000e+02 : f32
    %6 = vector.broadcast %cst_5 : f32 to vector<256x64xf32>
    %7 = arith.mulf %5, %6 : vector<256x64xf32>
    %cst_6 = arith.constant 2.000000e+01 : f32
    %8 = vector.broadcast %cst_6 : f32 to vector<256x64xf32>
    %9 = arith.minimumf %7, %8 : vector<256x64xf32>
    %10 = math.exp %9 : vector<256x64xf32>
    %11 = math.log1p %10 : vector<256x64xf32>
    %cst_7 = arith.constant 0.00999999977 : f32
    %12 = vector.broadcast %cst_7 : f32 to vector<256x64xf32>
    %13 = arith.mulf %11, %12 : vector<256x64xf32>
    %cst_8 = arith.constant 2.000000e+01 : f32
    %14 = vector.broadcast %cst_8 : f32 to vector<256x64xf32>
    %15 = arith.cmpf ogt, %7, %14 : vector<256x64xf32>
    %16 = arith.select %15, %5, %13 : vector<256x64xi1>, vector<256x64xf32>
    %c0_9 = arith.constant 0 : index
    %c0_10 = arith.constant 0 : index
    %17 = vector.load %arg4[%c0_9, %c0_10] : memref<64x32xf32, #tpu.memory_space<vmem>>, vector<64x32xf32>
    %cst_11 = arith.constant dense<0.000000e+00> : vector<256x32xf32>
    %18 = tpu.matmul %16, %17, %cst_11 {dimension_numbers = #tpu.dot_dimension_numbers<[1], [0], [0], [1], [0, 0, 1, 1], [], []>} : vector<256x64xf32>, vector<64x32xf32>, vector<256x32xf32> -> vector<256x32xf32>
    %c0_12 = arith.constant 0 : index
    %c0_13 = arith.constant 0 : index
    %19 = vector.load %arg5[%c0_12, %c0_13] : memref<1x32xf32, #tpu.memory_space<vmem>>, vector<1x32xf32>
    %20 = vector.broadcast %19 : vector<1x32xf32> to vector<256x32xf32>
    %21 = arith.addf %18, %20 : vector<256x32xf32>
    %c0_14 = arith.constant 0 : index
    %c0_15 = arith.constant 0 : index
    %22 = vector.load %arg6[%c0_14, %c0_15] : memref<256x32xf32, #tpu.memory_space<vmem>>, vector<256x32xf32>
    tpu.vector_store %arg6[%c0_14, %c0_15], %21 {strides = array<i32>} : memref<256x32xf32, #tpu.memory_space<vmem>>, vector<256x32xf32>,
    return
  }
  func.func @transform_0(%arg0: i32) -> (i32, i32) {
    %c0_i32 = arith.constant 0 : i32
    %c0_i32_0 = arith.constant 0 : i32
    return %arg0, %c0_i32 : i32, i32
  }
  func.func @transform_1(%arg0: i32) -> (i32, i32) {
    %c0_i32 = arith.constant 0 : i32
    %c0_i32_0 = arith.constant 0 : i32
    %c0_i32_1 = arith.constant 0 : i32
    return %c0_i32, %c0_i32_0 : i32, i32
  }
  func.func @transform_2(%arg0: i32) -> (i32, i32) {
    %c0_i32 = arith.constant 0 : i32
    %c0_i32_0 = arith.constant 0 : i32
    %c0_i32_1 = arith.constant 0 : i32
    return %c0_i32, %c0_i32_0 : i32, i32
  }
  func.func @transform_3(%arg0: i32) -> (i32, i32) {
    %c0_i32 = arith.constant 0 : i32
    %c0_i32_0 = arith.constant 0 : i32
    %c0_i32_1 = arith.constant 0 : i32
    return %c0_i32, %c0_i32_0 : i32, i32
  }
  func.func @transform_4(%arg0: i32) -> (i32, i32) {
    %c0_i32 = arith.constant 0 : i32
    %c0_i32_0 = arith.constant 0 : i32
    %c0_i32_1 = arith.constant 0 : i32
    return %c0_i32, %c0_i32_0 : i32, i32
  }
  func.func @transform_5(%arg0: i32) -> (i32, i32) {
    %c0_i32 = arith.constant 0 : i32
    %c0_i32_0 = arith.constant 0 : i32
    return %arg0, %c0_i32 : i32, i32
  }
}

</mosaic_0001>

<bundles_post_ra>
// kernel: mlp_col_neighbor.1
= control target key start
LH: loop header
LB: loop body
LE: loop exit
PB: predicated region body
PF: predicated region fallthrough
CT: control target
= control target key end

     0   :  { %s2050_s18 = smov 0   ;;  %s2052_s19 = smov 0   ;;  %s3016_s0 = inlined_call_operand.vmem [shape: f32[1030,64], index: 0, kind: input, shape index: {}]   ;;  %s3017_s1 = inlined_call_operand.vmem [shape: f32[64,64], index: 1, kind: input, shape index: {}]   ;;  %s3018_s2 = inlined_call_operand.vmem [shape: f32[1,64], index: 2, kind: input, shape index: {}]   ;;  %s3019_s3 = inlined_call_operand.vmem [shape: f32[64,32], index: 3, kind: input, shape index: {}]   ;;  %s3020_s4 = inlined_call_operand.vmem [shape: f32[1,32], index: 4, kind: input, shape index: {}]   ;;  %s3021_s5 = inlined_call_operand.vmem [shape: f32[1030,32], index: 5, kind: output, shape index: {}]  }
   0x1   :  { %s2054_s20 = smov 0  }
   0x2 LB: > { %s2063_s21 = sadd.s32 4294967295, %s1986_s20   ;;  %s2065_s22 = sadd.s32 1, %s1986_s20   ;;  %s1986_s20 = sphi %s2054_s20, %s3076_s20   ;;  %s1982_s19 = sphi %s2052_s19, %s3075_s19   ;;  %s1978_s18 = sphi %s2050_s18, %s3074_s18  }
   0x3   : > { %s129_s23 = ssub.s32 %s1986_s20, %s2065_s22  ;;  %s132_s24 = sadd.s32 1, %s1982_s19 }
   0x4   : > { %p130_p0 = scmp.eq.s32.totalorder %s129_s23, 0  ;;  %p142_p1 = scmp.ne.s32.totalorder %s1982_s19, %s1978_s18 }
   0x5   : > { %p143_p2 = scmp.eq.s32.totalorder %s2063_s21, 4  ;;  %p1609_p3 = scmp.ge.s32.totalorder %s1986_s20, 1 }
   0x6   : > { %s2073_s25 = scalar_select %p130_p0, %s1982_s19, %s132_s24  }
   0x7   : > { %p2075_p4 = por %p143_p2, %p142_p1  ;;  %p196_p5 = scmp.lt.s32.totalorder %s1986_s20, 6 }
   0x9   : > { %p197_p6 = pnand %p1609_p3, %p196_p5 }
   0xa   : > { %s2086_s6 = sshll.u32 (!%p197_p6), %s2063_s21, 5  ;;  %s224_s8 = sand.u32 (!%p197_p6), 1, %s1978_s18  }
   0xb   : > { %200 = sbr.rel (%p197_p6) target bundleno = 518 (0x206), region = 40  ;;  %p232_p7 = scmp.lt.s32.totalorder (!%p197_p6), %s2086_s6, 128 }
  0x10   : > { %v285_v0 = vld [vmem:[%s3017_s1 + $0x38] sm:$0xff]  ;;  %v284_v1 = vld [vmem:[%s3017_s1 + $0x30] sm:$0xff]  ;;  %v283_v2 = vld [vmem:[%s3017_s1 + $0x28] sm:$0xff]  ;;  %s233_s9 = scalar_select %p232_p7, %s2086_s6, 128  ;;  %vm290_vm0 = vcmask 523264  }
  0x11   : > { %395 = vmatpush.msra.mxu0 %v285_v0  ;;  %1697 = vmatpush.msra.mxu2 %v285_v0  ;;  %v282_v3 = vld [vmem:[%s3017_s1 + $0x20] sm:$0xff]  ;;  %v281_v4 = vld [vmem:[%s3017_s1 + $0x18] sm:$0xff]  ;;  %v280_v5 = vld [vmem:[%s3017_s1 + $0x10] sm:$0xff]  ;;  %s1274_s12 = ssub.s32 (%p2075_p4), 129, %s2086_s6  ;;  %s1694_s13 = sshll.u32 (%p2075_p4), %s2063_s21, 8 }
  0x12   : > { %s1612_s14 = sshll.u32 %s233_s9, 3  ;;  %v279_v6 = vld [vmem:[%s3017_s1 + $0x8] sm:$0xff]  ;;  %v278_v7 = vld [vmem:[%s3017_s1] sm:$0xff]  ;;  %v1019_v36 = vld [vmem:[%s3019_s3 + $0x38] sm:$0xff]  ;;  %s1610_s9 = sshll.u32 %s224_s8, 8 }
  0x13   : > { %396 = vmatpush.msra.mxu0 %v284_v1  ;;  %1698 = vmatpush.msra.mxu2 %v284_v1  ;;  %s2108_s27 = scalar_lea.vmem %s3016_s0, %s1612_s14  ;;  %v1018_v39 = vld [vmem:[%s3019_s3 + $0x30] sm:$0xff]  ;;  %v1017_v40 = vld [vmem:[%s3019_s3 + $0x28] sm:$0xff]  ;;  %v1016_v41 = vld [vmem:[%s3019_s3 + $0x20] sm:$0xff]  ;;  %s2774_s18 = scalar_lea.vmem [#allocation2], %s1610_s9  }
  0x14   : > { %v246_v8 = vld [vmem:[%s2108_s27] sm:$0xff]  ;;  %v247_v10 = vld [vmem:[%s2108_s27 + $0x8] sm:$0xff]  ;;  %v248_v12 = vld [vmem:[%s2108_s27 + $0x10] sm:$0xff]  ;;  %1128 = vmatpush.msra.mxu1 %v1019_v36  ;;  %1705 = vmatpush.msra.mxu3 %v1019_v36  ;;  %p1275_p8 = scmp.lt.s32.totalorder (%p2075_p4), %s1274_s12, 32  ;;  %s2881_s16 = scalar_lea.vmem (%p2075_p4), %s3021_s5, %s1694_s13  }
  0x15   : > { %397 = vmatpush.msra.mxu0 %v283_v2  ;;  %1699 = vmatpush.msra.mxu2 %v283_v2  ;;  %v262_v9 = vld [vmem:[%s2108_s27 + $0x80] sm:$0xff]  ;;  %v263_v11 = vld [vmem:[%s2108_s27 + $0x88] sm:$0xff]  ;;  %v264_v13 = vld [vmem:[%s2108_s27 + $0x90] sm:$0xff] }
  0x16   : > { %v249_v14 = vld [vmem:[%s2108_s27 + $0x18] sm:$0xff]  ;;  %v250_v16 = vld [vmem:[%s2108_s27 + $0x20] sm:$0xff]  ;;  %v251_v18 = vld [vmem:[%s2108_s27 + $0x28] sm:$0xff]  ;;  %1129 = vmatpush.msra.mxu1 %v1018_v39  ;;  %1706 = vmatpush.msra.mxu3 %v1018_v39 }
  0x17   : > { %398 = vmatpush.msra.mxu0 %v282_v3  ;;  %1700 = vmatpush.msra.mxu2 %v282_v3  ;;  %v265_v15 = vld [vmem:[%s2108_s27 + $0x98] sm:$0xff]  ;;  %v266_v17 = vld [vmem:[%s2108_s27 + $0xa0] sm:$0xff]  ;;  %v267_v19 = vld [vmem:[%s2108_s27 + $0xa8] sm:$0xff] }
  0x18   : > { %v252_v20 = vld [vmem:[%s2108_s27 + $0x30] sm:$0xff]  ;;  %v253_v22 = vld [vmem:[%s2108_s27 + $0x38] sm:$0xff]  ;;  %v254_v24 = vld [vmem:[%s2108_s27 + $0x40] sm:$0xff]  ;;  %1130 = vmatpush.msra.mxu1 %v1017_v40  ;;  %1707 = vmatpush.msra.mxu3 %v1017_v40 }
  0x19   : > { %399 = vmatpush.msra.mxu0 %v281_v4  ;;  %1701 = vmatpush.msra.mxu2 %v281_v4  ;;  %v268_v21 = vld [vmem:[%s2108_s27 + $0xb0] sm:$0xff]  ;;  %v269_v23 = vld [vmem:[%s2108_s27 + $0xb8] sm:$0xff]  ;;  %v270_v25 = vld [vmem:[%s2108_s27 + $0xc0] sm:$0xff] }
  0x1a   : > { %v255_v26 = vld [vmem:[%s2108_s27 + $0x48] sm:$0xff]  ;;  %v256_v28 = vld [vmem:[%s2108_s27 + $0x50] sm:$0xff]  ;;  %v257_v30 = vld [vmem:[%s2108_s27 + $0x58] sm:$0xff]  ;;  %1131 = vmatpush.msra.mxu1 %v1016_v41  ;;  %1708 = vmatpush.msra.mxu3 %v1016_v41 }
  0x1b   : > { %400 = vmatpush.msra.mxu0 %v280_v5  ;;  %1702 = vmatpush.msra.mxu2 %v280_v5  ;;  %v271_v27 = vld [vmem:[%s2108_s27 + $0xc8] sm:$0xff]  ;;  %v272_v29 = vld [vmem:[%s2108_s27 + $0xd0] sm:$0xff]  ;;  %v273_v31 = vld [vmem:[%s2108_s27 + $0xd8] sm:$0xff] }
  0x1c   : > { %v258_v32 = vld [vmem:[%s2108_s27 + $0x60] sm:$0xff]  ;;  %v259_v34 = vld [vmem:[%s2108_s27 + $0x68] sm:$0xff]  ;;  %v260_v37 = vld [vmem:[%s2108_s27 + $0x70] sm:$0xff] }
  0x1d   : > { %401 = vmatpush.msra.mxu0 %v279_v6  ;;  %1703 = vmatpush.msra.mxu2 %v279_v6  ;;  %v274_v33 = vld [vmem:[%s2108_s27 + $0xe0] sm:$0xff]  ;;  %v275_v35 = vld [vmem:[%s2108_s27 + $0xe8] sm:$0xff]  ;;  %v276_v38 = vld [vmem:[%s2108_s27 + $0xf0] sm:$0xff] }
  0x1e   : > { %v1015_v42 = vld [vmem:[%s3019_s3 + $0x18] sm:$0xff]  ;;  %v1014_v45 = vld [vmem:[%s3019_s3 + $0x10] sm:$0xff]  ;;  %v1013_v46 = vld [vmem:[%s3019_s3 + $0x8] sm:$0xff] }
  0x1f   : > { %402 = vmatpush.msra.mxu0 %v278_v7  ;;  %1704 = vmatpush.msra.mxu2 %v278_v7  ;;  %v261_v43 = vld [vmem:[%s2108_s27 + $0x78] sm:$0xff]  ;;  %v2201_v47 = vld [vmem:[%s3018_s2] ss:$0 sm:$0xff] }
  0x20   : > { %1613 = vmatmul.msk.f32.vlgmr.msra.gmra.mxu0 %vm290_vm0, %v246_v8  ;;  %1629 = vmatmul.msk.f32.vlgmr.msra.gmra.mxu2 %vm290_vm0, %v262_v9  ;;  %v277_v44 = vld [vmem:[%s2108_s27 + $0xf8] sm:$0xff]  ;;  %v1012_v48 = vld [vmem:[%s3019_s3] sm:$0xff] }
  0x21   : > { %1132 = vmatpush.msra.mxu1 %v1015_v42  ;;  %1709 = vmatpush.msra.mxu3 %v1015_v42 }
  0x23   : > { %1133 = vmatpush.msra.mxu1 %v1014_v45  ;;  %1710 = vmatpush.msra.mxu3 %v1014_v45 }
  0x25   : > { %1134 = vmatpush.msra.mxu1 %v1013_v46  ;;  %1711 = vmatpush.msra.mxu3 %v1013_v46 }
  0x27   : > { %1135 = vmatpush.msra.mxu1 %v1012_v48  ;;  %1712 = vmatpush.msra.mxu3 %v1012_v48 }
  0x28   : > { %1614 = vmatmul.msk.f32.gmra.mxu0 %vm290_vm0, %v247_v10  ;;  %1630 = vmatmul.msk.f32.gmra.mxu2 %vm290_vm0, %v263_v11 }
  0x30   : > { %1615 = vmatmul.msk.f32.gmra.mxu0 %vm290_vm0, %v248_v12  ;;  %1631 = vmatmul.msk.f32.gmra.mxu2 %vm290_vm0, %v264_v13 }
  0x38   : > { %1616 = vmatmul.msk.f32.gmra.mxu0 %vm290_vm0, %v249_v14  ;;  %1632 = vmatmul.msk.f32.gmra.mxu2 %vm290_vm0, %v265_v15 }
  0x40   : > { %1617 = vmatmul.msk.f32.gmra.mxu0 %vm290_vm0, %v250_v16  ;;  %1633 = vmatmul.msk.f32.gmra.mxu2 %vm290_vm0, %v266_v17 }
  0x48   : > { %1618 = vmatmul.msk.f32.gmra.mxu0 %vm290_vm0, %v251_v18  ;;  %1634 = vmatmul.msk.f32.gmra.mxu2 %vm290_vm0, %v267_v19 }
  0x50   : > { %1619 = vmatmul.msk.f32.gmra.mxu0 %vm290_vm0, %v252_v20  ;;  %1635 = vmatmul.msk.f32.gmra.mxu2 %vm290_vm0, %v268_v21 }
  0x58   : > { %1620 = vmatmul.msk.f32.gmra.mxu0 %vm290_vm0, %v253_v22  ;;  %1636 = vmatmul.msk.f32.gmra.mxu2 %vm290_vm0, %v269_v23 }
  0x60   : > { %1621 = vmatmul.msk.f32.gmra.mxu0 %vm290_vm0, %v254_v24  ;;  %1637 = vmatmul.msk.f32.gmra.mxu2 %vm290_vm0, %v270_v25 }
  0x68   : > { %1622 = vmatmul.msk.f32.gmra.mxu0 %vm290_vm0, %v255_v26  ;;  %1638 = vmatmul.msk.f32.gmra.mxu2 %vm290_vm0, %v271_v27 }
  0x70   : > { %1623 = vmatmul.msk.f32.gmra.mxu0 %vm290_vm0, %v256_v28  ;;  %1639 = vmatmul.msk.f32.gmra.mxu2 %vm290_vm0, %v272_v29 }
  0x78   : > { %1624 = vmatmul.msk.f32.gmra.mxu0 %vm290_vm0, %v257_v30  ;;  %1640 = vmatmul.msk.f32.gmra.mxu2 %vm290_vm0, %v273_v31 }
  0x80   : > { %1625 = vmatmul.msk.f32.gmra.mxu0 %vm290_vm0, %v258_v32  ;;  %1641 = vmatmul.msk.f32.gmra.mxu2 %vm290_vm0, %v274_v33 }
  0x88   : > { %1626 = vmatmul.msk.f32.gmra.mxu0 %vm290_vm0, %v259_v34  ;;  %1642 = vmatmul.msk.f32.gmra.mxu2 %vm290_vm0, %v275_v35 }
  0x90   : > { %1627 = vmatmul.msk.f32.gmra.mxu0 %vm290_vm0, %v260_v37  ;;  %1643 = vmatmul.msk.f32.gmra.mxu2 %vm290_vm0, %v276_v38 }
  0x98   : > { %1628 = vmatmul.msk.f32.gmra.mxu0 %vm290_vm0, %v261_v43  ;;  %1644 = vmatmul.msk.f32.gmra.mxu2 %vm290_vm0, %v277_v44 }
  0x9d   : > { %v404_v49 = vpop.f32.mrf.mxu0 }
  0x9e   : > { %v2207_v50 = vadd.f32 %v2201_v47, %v404_v49 }
  0xa0   : > { %v2210_v51 = vmul.f32 100.0, %v2207_v50 }
  0xa2   : > { %v532_v52 = vmin.f32 %v2210_v51, 20.0  ;;  %vm948_vm2 = vcmp.gt.f32.partialorder %v2210_v51, 20.0 }
  0xa3   : > { %v452_v53 = vpop.f32.mrf.mxu2 }
  0xa4   : > { %v564_v54 = vmul.f32 1.442695, %v532_v52  ;;  %v2214_v55 = vadd.f32 %v2201_v47, %v452_v53 }
  0xa5   : > { %v407_v56 = vpop.f32.mrf.mxu0 }
  0xa6   : > { %1803 = vpow2.f32 %v564_v54  ;;  %v2217_v57 = vmul.f32 100.0, %v2214_v55  ;;  %v2220_v58 = vadd.f32 %v2201_v47, %v407_v56 }
  0xa8   : > { %v548_v59 = vmin.f32 %v2217_v57, 20.0  ;;  %v2224_v60 = vmul.f32 100.0, %v2220_v58  ;;  %vm964_vm3 = vcmp.gt.f32.partialorder %v2217_v57, 20.0 }
  0xaa   : > { %v596_v61 = vmul.f32 1.442695, %v548_v59  ;;  %v533_v62 = vmin.f32 %v2224_v60, 20.0  ;;  %vm949_vm6 = vcmp.gt.f32.partialorder %v2224_v60, 20.0 }
  0xab   : > { %v455_v63 = vpop.f32.mrf.mxu2 }
  0xac   : > { %v1804_v0 = vpop.eup %1803  ;;  %1805 = vpow2.f32 %v596_v61  ;;  %v566_v1 = vmul.f32 1.442695, %v533_v62  ;;  %v2228_v2 = vadd.f32 %v2201_v47, %v455_v63 }
  0xad   : > { %v410_v3 = vpop.f32.mrf.mxu0  ;;  %v628_v4 = vadd.f32 1.0, %v1804_v0  ;;  %v631_v5 = vmul.f32 -0.5, %v1804_v0  ;;  %v634_v8 = vand.u32 2147483647, %v1804_v0 }
  0xae   : > { %1807 = vpow2.f32 %v566_v1  ;;  %v2231_v6 = vmul.f32 100.0, %v2228_v2  ;;  %v2234_v7 = vadd.f32 %v2201_v47, %v410_v3 }
  0xaf   : > { %1809 = vlog2.f32 %v628_v4  ;;  %v632_v11 = vadd.f32 1.0, %v631_v5  ;;  %vm2241_vm1 = vcmp.lt.f32.partialorder %v634_v8, 0.0004427343 }
  0xb0   : > { %v549_v9 = vmin.f32 %v2231_v6, 20.0  ;;  %v2238_v10 = vmul.f32 100.0, %v2234_v7  ;;  %vm965_vm7 = vcmp.gt.f32.partialorder %v2231_v6, 20.0 }
  0xb1   : > { %v633_v22 = vmul.f32 %v1804_v0, %v632_v11 }
  0xb2   : > { %v1806_v12 = vpop.eup %1805  ;;  %v598_v13 = vmul.f32 1.442695, %v549_v9  ;;  %v534_v14 = vmin.f32 %v2238_v10, 20.0  ;;  %vm950_vm9 = vcmp.gt.f32.partialorder %v2238_v10, 20.0 }
  0xb3   : > { %v458_v15 = vpop.f32.mrf.mxu2  ;;  %v772_v17 = vadd.f32 1.0, %v1806_v12  ;;  %v775_v18 = vmul.f32 -0.5, %v1806_v12  ;;  %v778_v26 = vand.u32 2147483647, %v1806_v12 }
  0xb4   : > { %v1808_v19 = vpop.eup %1807  ;;  %1811 = vpow2.f32 %v598_v13  ;;  %v568_v20 = vmul.f32 1.442695, %v534_v14  ;;  %v2246_v21 = vadd.f32 %v2201_v47, %v458_v15 }
  0xb5   : > { %v1810_v23 = vpop.eup %1809  ;;  %v413_v24 = vpop.f32.mrf.mxu0  ;;  %1813 = vlog2.f32 %v772_v17  ;;  %v776_v25 = vadd.f32 1.0, %v775_v18  ;;  %v637_v27 = vadd.f32 1.0, %v1808_v19  ;;  %v640_v31 = vmul.f32 -0.5, %v1808_v19 }
  0xb6   : > { %1815 = vpow2.f32 %v568_v20  ;;  %v2249_v28 = vmul.f32 100.0, %v2246_v21  ;;  %v2252_v29 = vadd.f32 %v2201_v47, %v413_v24  ;;  %v630_v30 = vmul.f32 0.6931472, %v1810_v23 }
  0xb7   : > { %1817 = vlog2.f32 %v637_v27  ;;  %v643_v32 = vand.u32 2147483647, %v1808_v19  ;;  %v641_v37 = vadd.f32 1.0, %v640_v31  ;;  %v777_v41 = vmul.f32 %v1806_v12, %v776_v25 }
  0xb8   : > { %v550_v33 = vmin.f32 %v2249_v28, 20.0  ;;  %v2256_v34 = vmul.f32 100.0, %v2252_v29  ;;  %v636_v35 = vsel %vm2241_vm1, %v633_v22, %v630_v30  ;;  %vm2263_vm4 = vcmp.lt.f32.partialorder %v778_v26, 0.0004427343 }
  0xb9   : > { %v916_v36 = vmul.f32 0.01, %v636_v35  ;;  %vm2268_vm5 = vcmp.lt.f32.partialorder %v643_v32, 0.0004427343  ;;  %vm966_vm12 = vcmp.gt.f32.partialorder %v2249_v28, 20.0 }
  0xba   : > { %v1812_v38 = vpop.eup %1811  ;;  %v600_v39 = vmul.f32 1.442695, %v550_v33  ;;  %v535_v40 = vmin.f32 %v2256_v34, 20.0  ;;  %vm951_vm13 = vcmp.gt.f32.partialorder %v2256_v34, 20.0 }
  0xbb   : > { %v1814_v43 = vpop.eup %1813  ;;  %v461_v44 = vpop.f32.mrf.mxu2  ;;  %v980_v45 = vsel %vm948_vm2, %v2207_v50, %v916_v36  ;;  %v781_v48 = vadd.f32 1.0, %v1812_v38  ;;  %v784_v49 = vmul.f32 -0.5, %v1812_v38  ;;  %v642_v50 = vmul.f32 %v1808_v19, %v641_v37 }
  0xbc   : > { %v1816_v51 = vpop.eup %1815  ;;  %1819 = vpow2.f32 %v600_v39  ;;  %v570_v52 = vmul.f32 1.442695, %v535_v40  ;;  %v2274_v53 = vadd.f32 %v2201_v47, %v461_v44  ;;  %1645 = vmatmul.msk.f32.vlgmr.msra.gmra.mxu1 %vm290_vm0, %v980_v45  ;;  %v774_v54 = vmul.f32 0.6931472, %v1814_v43 }
  0xbd   : > { %v1818_v56 = vpop.eup %1817  ;;  %v416_v59 = vpop.f32.mrf.mxu0  ;;  %1821 = vlog2.f32 %v781_v48  ;;  %v785_v61 = vadd.f32 1.0, %v784_v49  ;;  %v646_v62 = vadd.f32 1.0, %v1816_v51  ;;  %v787_v5 = vand.u32 2147483647, %v1812_v38 }
  0xbe   : > { %1823 = vpow2.f32 %v570_v52  ;;  %v2278_v63 = vmul.f32 100.0, %v2274_v53  ;;  %v2281_v0 = vadd.f32 %v2201_v47, %v416_v59  ;;  %v780_v1 = vsel %vm2263_vm4, %v777_v41, %v774_v54 }
  0xbf   : > { %v932_v3 = vmul.f32 0.01, %v780_v1  ;;  %v639_v4 = vmul.f32 0.6931472, %v1818_v56  ;;  %1825 = vlog2.f32 %v646_v62  ;;  %v649_v11 = vmul.f32 -0.5, %v1816_v51 }
  0xc0   : > { %v551_v8 = vmin.f32 %v2278_v63, 20.0  ;;  %v2287_v9 = vmul.f32 100.0, %v2281_v0  ;;  %v652_v14 = vand.u32 2147483647, %v1816_v51  ;;  %v786_v23 = vmul.f32 %v1812_v38, %v785_v61 }
  0xc1   : > { %v996_v12 = vsel %vm964_vm3, %v2214_v55, %v932_v3  ;;  %v645_v13 = vsel %vm2268_vm5, %v642_v50, %v639_v4  ;;  %v650_v19 = vadd.f32 1.0, %v649_v11  ;;  %vm2297_vm8 = vcmp.lt.f32.partialorder %v787_v5, 0.0004427343 }
  0xc2   : > { %v1820_v15 = vpop.eup %1819  ;;  %v602_v16 = vmul.f32 1.442695, %v551_v8  ;;  %v536_v17 = vmin.f32 %v2287_v9, 20.0  ;;  %1661 = vmatmul.msk.f32.vlgmr.msra.gmra.mxu3 %vm290_vm0, %v996_v12  ;;  %v917_v18 = vmul.f32 0.01, %v645_v13  ;;  %vm967_vm1 = vcmp.gt.f32.partialorder %v2278_v63, 20.0 }
  0xc3   : > { %v1822_v20 = vpop.eup %1821  ;;  %v464_v22 = vpop.f32.mrf.mxu2  ;;  %v790_v55 = vadd.f32 1.0, %v1820_v15  ;;  %v793_v24 = vmul.f32 -0.5, %v1820_v15  ;;  %v651_v33 = vmul.f32 %v1816_v51, %v650_v19  ;;  %v796_v35 = vand.u32 2147483647, %v1820_v15 }
  0xc4   : > { %v1824_v25 = vpop.eup %1823  ;;  %1827 = vpow2.f32 %v602_v16  ;;  %v572_v26 = vmul.f32 1.442695, %v536_v17  ;;  %v2303_v27 = vadd.f32 %v2201_v47, %v464_v22  ;;  %v981_v30 = vsel %vm949_vm6, %v2220_v58, %v917_v18 }
  0xc5   : > { %1646 = vmatmul.msk.f32.gmra.mxu1 %vm290_vm0, %v981_v30  ;;  %v419_v31 = vpop.f32.mrf.mxu0  ;;  %v783_v32 = vmul.f32 0.6931472, %v1822_v20  ;;  %1829 = vlog2.f32 %v790_v55  ;;  %v1826_v36 = vpop.eup %1825  ;;  %vm2315_vm10 = vcmp.lt.f32.partialorder %v652_v14, 0.0004427343  ;;  %v794_v40 = vadd.f32 1.0, %v793_v24 }
  0xc6   : > { %1831 = vpow2.f32 %v572_v26  ;;  %v2310_v37 = vmul.f32 100.0, %v2303_v27  ;;  %v2313_v38 = vadd.f32 %v2201_v47, %v419_v31  ;;  %v648_v60 = vmul.f32 0.6931472, %v1826_v36 }
  0xc7   : > { %v789_v58 = vsel %vm2297_vm8, %v786_v23, %v783_v32  ;;  %v655_v41 = vadd.f32 1.0, %v1824_v25  ;;  %v658_v45 = vmul.f32 -0.5, %v1824_v25  ;;  %vm2327_vm11 = vcmp.lt.f32.partialorder %v796_v35, 0.0004427343 }
  0xc8   : > { %v552_v42 = vmin.f32 %v2310_v37, 20.0  ;;  %v2323_v43 = vmul.f32 100.0, %v2313_v38  ;;  %v933_v44 = vmul.f32 0.01, %v789_v58  ;;  %v654_v46 = vsel %vm2315_vm10, %v651_v33, %v648_v60 }
  0xc9   : > { %1833 = vlog2.f32 %v655_v41  ;;  %v661_v49 = vand.u32 2147483647, %v1824_v25  ;;  %v918_v59 = vmul.f32 0.01, %v654_v46  ;;  %v795_v62 = vmul.f32 %v1820_v15, %v794_v40 }
  0xca   : > { %v1828_v51 = vpop.eup %1827  ;;  %v604_v52 = vmul.f32 1.442695, %v552_v42  ;;  %v537_v54 = vmin.f32 %v2323_v43, 20.0  ;;  %v997_v56 = vsel %vm965_vm7, %v2228_v2, %v933_v44  ;;  %v659_v1 = vadd.f32 1.0, %v658_v45 }
  0xcb   : > { %v1830_v50 = vpop.eup %1829  ;;  %1662 = vmatmul.msk.f32.gmra.mxu3 %vm290_vm0, %v997_v56  ;;  %v467_v61 = vpop.f32.mrf.mxu2  ;;  %v799_v3 = vadd.f32 1.0, %v1828_v51  ;;  %v802_v4 = vmul.f32 -0.5, %v1828_v51  ;;  %v982_v6 = vsel %vm950_vm9, %v2234_v7, %v918_v59  ;;  %vm2345_vm14 = vcmp.lt.f32.partialorder %v661_v49, 0.0004427343 }
  0xcc   : > { %v1832_v5 = vpop.eup %1831  ;;  %1835 = vpow2.f32 %v604_v52  ;;  %v574_v8 = vmul.f32 1.442695, %v537_v54  ;;  %v2338_v11 = vadd.f32 %v2201_v47, %v467_v61  ;;  %v792_v12 = vmul.f32 0.6931472, %v1830_v50 }
  0xcd   : > { %1647 = vmatmul.msk.f32.gmra.mxu1 %vm290_vm0, %v982_v6  ;;  %v422_v2 = vpop.f32.mrf.mxu0  ;;  %v660_v13 = vmul.f32 %v1824_v25, %v659_v1  ;;  %1837 = vlog2.f32 %v799_v3  ;;  %v803_v10 = vadd.f32 1.0, %v802_v4  ;;  %v805_v7 = vand.u32 2147483647, %v1828_v51 }
  0xce   : > { %v2350_v15 = vmul.f32 100.0, %v2338_v11  ;;  %v2353_v16 = vadd.f32 %v2201_v47, %v422_v2  ;;  %1839 = vpow2.f32 %v574_v8  ;;  %v798_v18 = vsel %vm2327_vm11, %v795_v62, %v792_v12 }
  0xcf   : > { %v1834_v17 = vpop.eup %1833  ;;  %v664_v19 = vadd.f32 1.0, %v1832_v5  ;;  %v667_v20 = vmul.f32 -0.5, %v1832_v5  ;;  %v934_v57 = vmul.f32 0.01, %v798_v18  ;;  %vm2361_vm15 = vcmp.lt.f32.partialorder %v805_v7, 0.0004427343 }
  0xd0   : > { %v553_v22 = vmin.f32 %v2350_v15, 20.0  ;;  %v2359_v23 = vmul.f32 100.0, %v2353_v16  ;;  %v657_v55 = vmul.f32 0.6931472, %v1834_v17  ;;  %v804_v58 = vmul.f32 %v1828_v51, %v803_v10 }
  0xd1   : > { %1841 = vlog2.f32 %v664_v19  ;;  %v668_v25 = vadd.f32 1.0, %v667_v20  ;;  %v998_v32 = vsel %vm966_vm12, %v2246_v21, %v934_v57  ;;  %v670_v60 = vand.u32 2147483647, %v1832_v5 }
  0xd2   : > { %v1836_v26 = vpop.eup %1835  ;;  %v606_v30 = vmul.f32 1.442695, %v553_v22  ;;  %v538_v31 = vmin.f32 %v2359_v23, 20.0  ;;  %v663_v33 = vsel %vm2345_vm14, %v660_v13, %v657_v55  ;;  %vm952_vm3 = vcmp.gt.f32.partialorder %v2287_v9, 20.0 }
  0xd3   : > { %v1838_v35 = vpop.eup %1837  ;;  %1663 = vmatmul.msk.f32.gmra.mxu3 %vm290_vm0, %v998_v32  ;;  %v470_v36 = vpop.f32.mrf.mxu2  ;;  %v919_v39 = vmul.f32 0.01, %v663_v33  ;;  %v808_v40 = vadd.f32 1.0, %v1836_v26  ;;  %v811_v46 = vmul.f32 -0.5, %v1836_v26  ;;  %v814_v48 = vand.u32 2147483647, %v1836_v26 }
  0xd4   : > { %1843 = vpow2.f32 %v606_v30  ;;  %v576_v41 = vmul.f32 1.442695, %v538_v31  ;;  %v2374_v42 = vadd.f32 %v2201_v47, %v470_v36  ;;  %v801_v44 = vmul.f32 0.6931472, %v1838_v35  ;;  %v1840_v45 = vpop.eup %1839 }
  0xd5   : > { %v983_v21 = vsel %vm951_vm13, %v2252_v29, %v919_v39  ;;  %v425_v28 = vpop.f32.mrf.mxu0  ;;  %1845 = vlog2.f32 %v808_v40  ;;  %v669_v54 = vmul.f32 %v1832_v5, %v668_v25  ;;  %vm2388_vm2 = vcmp.lt.f32.partialorder %v670_v60, 0.0004427343 }
  0xd6   : > { %v2380_v49 = vmul.f32 100.0, %v2374_v42  ;;  %1648 = vmatmul.msk.f32.gmra.mxu1 %vm290_vm0, %v983_v21  ;;  %v2384_v51 = vadd.f32 %v2201_v47, %v425_v28  ;;  %v807_v52 = vsel %vm2361_vm15, %v804_v58, %v801_v44  ;;  %1847 = vpow2.f32 %v576_v41 }
  0xd7   : > { %v1842_v56 = vpop.eup %1841  ;;  %v935_v34 = vmul.f32 0.01, %v807_v52  ;;  %v812_v59 = vadd.f32 1.0, %v811_v46  ;;  %v673_v1 = vadd.f32 1.0, %v1840_v45  ;;  %vm2400_vm4 = vcmp.lt.f32.partialorder %v814_v48, 0.0004427343 }
  0xd8   : > { %v554_v50 = vmin.f32 %v2380_v49, 20.0  ;;  %v2394_v61 = vmul.f32 100.0, %v2384_v51  ;;  %v666_v62 = vmul.f32 0.6931472, %v1842_v56  ;;  %v676_v5 = vmul.f32 -0.5, %v1840_v45 }
  0xd9   : > { %v999_v3 = vsel %vm967_vm1, %v2274_v53, %v935_v34  ;;  %1849 = vlog2.f32 %v673_v1  ;;  %v813_v14 = vmul.f32 %v1836_v26, %v812_v59  ;;  %v679_v7 = vand.u32 2147483647, %v1840_v45 }
  0xda   : > { %v1844_v8 = vpop.eup %1843  ;;  %v608_v6 = vmul.f32 1.442695, %v554_v50  ;;  %v539_v2 = vmin.f32 %v2394_v61, 20.0  ;;  %v672_v12 = vsel %vm2388_vm2, %v669_v54, %v666_v62  ;;  %v677_v10 = vadd.f32 1.0, %v676_v5 }
  0xdb   : > { %v1846_v13 = vpop.eup %1845  ;;  %1664 = vmatmul.msk.f32.gmra.mxu3 %vm290_vm0, %v999_v3  ;;  %v473_v63 = vpop.f32.mrf.mxu2  ;;  %v920_v53 = vmul.f32 0.01, %v672_v12  ;;  %vm968_vm5 = vcmp.gt.f32.partialorder %v2310_v37, 20.0  ;;  %v817_v55 = vadd.f32 1.0, %v1844_v8  ;;  %v820_v24 = vmul.f32 -0.5, %v1844_v8 }
  0xdc   : > { %1851 = vpow2.f32 %v608_v6  ;;  %v578_v17 = vmul.f32 1.442695, %v539_v2  ;;  %v2409_v18 = vadd.f32 %v2201_v47, %v473_v63  ;;  %v810_v19 = vmul.f32 0.6931472, %v1846_v13  ;;  %v1848_v20 = vpop.eup %1847 }
  0xdd   : > { %v984_v22 = vsel %vm952_vm3, %v2281_v0, %v920_v53  ;;  %v428_v57 = vpop.f32.mrf.mxu0  ;;  %v678_v9 = vmul.f32 %v1840_v45, %v677_v10  ;;  %v821_v0 = vadd.f32 1.0, %v820_v24  ;;  %vm2428_vm6 = vcmp.lt.f32.partialorder %v679_v7, 0.0004427343 }
  0xde   : > { %1853 = vpow2.f32 %v578_v17  ;;  %v2416_v25 = vmul.f32 100.0, %v2409_v18  ;;  %1649 = vmatmul.msk.f32.gmra.mxu1 %vm290_vm0, %v984_v22  ;;  %v2420_v26 = vadd.f32 %v2201_v47, %v428_v57  ;;  %v816_v30 = vsel %vm2400_vm4, %v813_v14, %v810_v19 }
  0xdf   : > { %v936_v31 = vmul.f32 0.01, %v816_v30  ;;  %1855 = vlog2.f32 %v817_v55  ;;  %v1850_v32 = vpop.eup %1849  ;;  %v682_v39 = vadd.f32 1.0, %v1848_v20  ;;  %vm953_vm7 = vcmp.gt.f32.partialorder %v2323_v43, 20.0 }
  0xe0   : > { %v555_v33 = vmin.f32 %v2416_v25, 20.0  ;;  %v2426_v35 = vmul.f32 100.0, %v2420_v26  ;;  %v675_v60 = vmul.f32 0.6931472, %v1850_v32  ;;  %v823_v40 = vand.u32 2147483647, %v1844_v8 }
  0xe1   : > { %v1000_v58 = vsel %vm968_vm5, %v2303_v27, %v936_v31  ;;  %1857 = vlog2.f32 %v682_v39  ;;  %v685_v21 = vmul.f32 -0.5, %v1848_v20  ;;  %v822_v48 = vmul.f32 %v1844_v8, %v821_v0 }
  0xe2   : > { %v1852_v41 = vpop.eup %1851  ;;  %v610_v44 = vmul.f32 1.442695, %v555_v33  ;;  %v540_v45 = vmin.f32 %v2426_v35, 20.0  ;;  %v681_v46 = vsel %vm2428_vm6, %v678_v9, %v675_v60  ;;  %vm969_vm8 = vcmp.gt.f32.partialorder %v2350_v15, 20.0 }
  0xe3   : > { %1665 = vmatmul.msk.f32.gmra.mxu3 %vm290_vm0, %v1000_v58  ;;  %v476_v28 = vpop.f32.mrf.mxu2  ;;  %v688_v27 = vand.u32 2147483647, %v1848_v20  ;;  %v826_v37 = vadd.f32 1.0, %v1852_v41  ;;  %v921_v34 = vmul.f32 0.01, %v681_v46  ;;  %v686_v62 = vadd.f32 1.0, %v685_v21 }
  0xe4   : > { %v1854_v52 = vpop.eup %1853  ;;  %1859 = vpow2.f32 %v610_v44  ;;  %v580_v54 = vmul.f32 1.442695, %v540_v45  ;;  %v2442_v56 = vadd.f32 %v2201_v47, %v476_v28  ;;  %vm2444_vm9 = vcmp.lt.f32.partialorder %v823_v40, 0.0004427343 }
  0xe5   : > { %v1856_v29 = vpop.eup %1855  ;;  %v431_v59 = vpop.f32.mrf.mxu0  ;;  %1861 = vlog2.f32 %v826_v37  ;;  %v829_v1 = vmul.f32 -0.5, %v1852_v41  ;;  %v985_v4 = vsel %vm953_vm7, %v2313_v38, %v921_v34  ;;  %vm2457_vm10 = vcmp.lt.f32.partialorder %v688_v27, 0.0004427343 }
  0xe6   : > { %v2449_v3 = vmul.f32 100.0, %v2442_v56  ;;  %v2455_v5 = vadd.f32 %v2201_v47, %v431_v59  ;;  %1650 = vmatmul.msk.f32.gmra.mxu1 %vm290_vm0, %v985_v4  ;;  %v819_v6 = vmul.f32 0.6931472, %v1856_v29  ;;  %v687_v2 = vmul.f32 %v1848_v20, %v686_v62 }
  0xe7   : > { %v830_v12 = vadd.f32 1.0, %v829_v1  ;;  %v832_v13 = vand.u32 2147483647, %v1852_v41  ;;  %v1858_v63 = vpop.eup %1857  ;;  %1863 = vpow2.f32 %v580_v54  ;;  %v691_v38 = vadd.f32 1.0, %v1854_v52 }
  0xe8   : > { %v556_v53 = vmin.f32 %v2449_v3, 20.0  ;;  %v2464_v43 = vmul.f32 100.0, %v2455_v5  ;;  %v825_v14 = vsel %vm2444_vm9, %v822_v48, %v819_v6  ;;  %v684_v10 = vmul.f32 0.6931472, %v1858_v63 }
  0xe9   : > { %vm954_vm11 = vcmp.gt.f32.partialorder %v2359_v23, 20.0  ;;  %v831_v7 = vmul.f32 %v1852_v41, %v830_v12  ;;  %v937_v22 = vmul.f32 0.01, %v825_v14  ;;  %1865 = vlog2.f32 %v691_v38 }
  0xea   : > { %v2469_v17 = vpop.eup %1859  ;;  %v612_v19 = vmul.f32 1.442695, %v556_v53  ;;  %v541_v20 = vmin.f32 %v2464_v43, 20.0  ;;  %v690_v24 = vsel %vm2457_vm10, %v687_v2, %v684_v10  ;;  %vm2474_vm12 = vcmp.lt.f32.partialorder %v832_v13, 0.0004427343 }
  0xeb   : > { %v1862_v57 = vpop.eup %1861  ;;  %v479_v55 = vpop.f32.mrf.mxu2  ;;  %v694_v31 = vmul.f32 -0.5, %v1854_v52  ;;  %v697_v9 = vand.u32 2147483647, %v1854_v52  ;;  %v1001_v32 = vsel %vm969_vm8, %v2338_v11, %v937_v22  ;;  %v922_v36 = vmul.f32 0.01, %v690_v24 }
  0xec   : > { %1867 = vpow2.f32 %v612_v19  ;;  %v582_v0 = vmul.f32 1.442695, %v541_v20  ;;  %v2482_v33 = vadd.f32 %v2201_v47, %v479_v55  ;;  %1666 = vmatmul.msk.f32.gmra.mxu3 %vm290_vm0, %v1001_v32  ;;  %v828_v58 = vmul.f32 0.6931472, %v1862_v57 }
  0xed   : > { %v434_v39 = vpop.f32.mrf.mxu0  ;;  %v695_v60 = vadd.f32 1.0, %v694_v31  ;;  %v835_v40 = vadd.f32 1.0, %v2469_v17  ;;  %v1864_v41 = vpop.eup %1863  ;;  %vm2492_vm13 = vcmp.lt.f32.partialorder %v697_v9, 0.0004427343  ;;  %v986_v15 = vsel %vm954_vm11, %v2353_v16, %v922_v36 }
  0xee   : > { %1869 = vpow2.f32 %v582_v0  ;;  %v2487_v44 = vmul.f32 100.0, %v2482_v33  ;;  %v2490_v45 = vadd.f32 %v2201_v47, %v434_v39  ;;  %v834_v21 = vsel %vm2474_vm12, %v831_v7, %v828_v58  ;;  %1651 = vmatmul.msk.f32.gmra.mxu1 %vm290_vm0, %v986_v15 }
  0xef   : > { %v696_v28 = vmul.f32 %v1854_v52, %v695_v60  ;;  %1871 = vlog2.f32 %v835_v40  ;;  %v1866_v46 = vpop.eup %1865  ;;  %v938_v37 = vmul.f32 0.01, %v834_v21  ;;  %v838_v54 = vmul.f32 -0.5, %v2469_v17 }
  0xf0   : > { %v557_v48 = vmin.f32 %v2487_v44, 20.0  ;;  %v2504_v27 = vmul.f32 100.0, %v2490_v45  ;;  %vm970_vm14 = vcmp.gt.f32.partialorder %v2380_v49, 20.0  ;;  %v693_v23 = vmul.f32 0.6931472, %v1866_v46 }
  0xf1   : > { %v700_v16 = vadd.f32 1.0, %v1864_v41  ;;  %v1002_v59 = vsel %vm970_vm14, %v2374_v42, %v938_v37  ;;  %v841_v50 = vand.u32 2147483647, %v2469_v17  ;;  %v839_v4 = vadd.f32 1.0, %v838_v54 }
  0xf2   : > { %v2508_v34 = vpop.eup %1867  ;;  %v614_v29 = vmul.f32 1.442695, %v557_v48  ;;  %v542_v52 = vmin.f32 %v2504_v27, 20.0  ;;  %v699_v1 = vsel %vm2492_vm13, %v696_v28, %v693_v23  ;;  %v703_v8 = vmul.f32 -0.5, %v1864_v41 }
  0xf3   : > { %v482_v62 = vpop.f32.mrf.mxu2  ;;  %1873 = vlog2.f32 %v700_v16  ;;  %v923_v2 = vmul.f32 0.01, %v699_v1  ;;  %vm955_vm15 = vcmp.gt.f32.partialorder %v2394_v61, 20.0  ;;  %vm971_vm1 = vcmp.gt.f32.partialorder %v2416_v25, 20.0 }
  0xf4   : > { %v2515_v6 = vpop.eup %1869  ;;  %v2518_v49 = vadd.f32 %v2201_v47, %v482_v62  ;;  %1875 = vpow2.f32 %v614_v29  ;;  %1667 = vmatmul.msk.f32.gmra.mxu3 %vm290_vm0, %v1002_v59  ;;  %v704_v13 = vadd.f32 1.0, %v703_v8  ;;  %v706_v63 = vand.u32 2147483647, %v1864_v41 }
  0xf5   : > { %v1872_v12 = vpop.eup %1871  ;;  %v437_v42 = vpop.f32.mrf.mxu0  ;;  %v584_v53 = vmul.f32 1.442695, %v542_v52  ;;  %v987_v14 = vsel %vm955_vm15, %v2384_v51, %v923_v2  ;;  %v840_v61 = vmul.f32 %v2469_v17, %v839_v4  ;;  %vm842_vm2 = vcmp.lt.f32.partialorder %v841_v50, 0.0004427343 }
  0xf6   : > { %v2524_v38 = vmul.f32 100.0, %v2518_v49  ;;  %v2528_v10 = vadd.f32 %v2201_v47, %v437_v42  ;;  %v837_v7 = vmul.f32 0.6931472, %v1872_v12  ;;  %v844_v19 = vadd.f32 1.0, %v2508_v34  ;;  %1652 = vmatmul.msk.f32.gmra.mxu1 %vm290_vm0, %v987_v14 }
  0xf7   : > { %v705_v57 = vmul.f32 %v1864_v41, %v704_v13  ;;  %v847_v55 = vmul.f32 -0.5, %v2508_v34  ;;  %vm2538_vm3 = vcmp.lt.f32.partialorder %v706_v63, 0.0004427343  ;;  %v709_v17 = vadd.f32 1.0, %v2515_v6 }
  0xf8   : > { %v558_v20 = vmin.f32 %v2524_v38, 20.0  ;;  %v2535_v22 = vmul.f32 100.0, %v2528_v10  ;;  %v843_v24 = vsel %vm842_vm2, %v840_v61, %v837_v7  ;;  %1877 = vlog2.f32 %v844_v19 }
  0xf9   : > { %v1874_v51 = vpop.eup %1873  ;;  %1879 = vpow2.f32 %v584_v53  ;;  %v939_v0 = vmul.f32 0.01, %v843_v24  ;;  %v848_v58 = vadd.f32 1.0, %v847_v55  ;;  %v712_v60 = vmul.f32 -0.5, %v2515_v6 }
  0xfa   : > { %v616_v31 = vmul.f32 1.442695, %v558_v20  ;;  %v543_v9 = vmin.f32 %v2535_v22, 20.0  ;;  %v2544_v32 = vpop.eup %1875  ;;  %v702_v39 = vmul.f32 0.6931472, %v1874_v51  ;;  %1881 = vlog2.f32 %v709_v17 }
  0xfb   : > { %v485_v36 = vpop.f32.mrf.mxu2  ;;  %v1003_v40 = vsel %vm971_vm1, %v2409_v18, %v939_v0  ;;  %vm956_vm4 = vcmp.gt.f32.partialorder %v2426_v35, 20.0  ;;  %v850_v11 = vand.u32 2147483647, %v2508_v34  ;;  %vm972_vm5 = vcmp.gt.f32.partialorder %v2449_v3, 20.0 }
  0xfc   : > { %v2551_v41 = vadd.f32 %v2201_v47, %v485_v36  ;;  %1668 = vmatmul.msk.f32.gmra.mxu3 %vm290_vm0, %v1003_v40  ;;  %v708_v15 = vsel %vm2538_vm3, %v705_v57, %v702_v39  ;;  %v713_v28 = vadd.f32 1.0, %v712_v60  ;;  %v715_v46 = vand.u32 2147483647, %v2515_v6 }
  0xfd   : > { %v440_v21 = vpop.f32.mrf.mxu0  ;;  %1883 = vpow2.f32 %v616_v31  ;;  %v924_v25 = vmul.f32 0.01, %v708_v15  ;;  %v586_v54 = vmul.f32 1.442695, %v543_v9  ;;  %v849_v23 = vmul.f32 %v2508_v34, %v848_v58 }
  0xfe   : > { %v2561_v18 = vmul.f32 100.0, %v2551_v41  ;;  %v2564_v48 = vadd.f32 %v2201_v47, %v440_v21  ;;  %v1878_v37 = vpop.eup %1877  ;;  %v714_v16 = vmul.f32 %v2515_v6, %v713_v28  ;;  %v853_v29 = vadd.f32 1.0, %v2544_v32 }
  0xff   : > { %v1880_v52 = vpop.eup %1879  ;;  %v988_v50 = vsel %vm956_vm4, %v2420_v26, %v924_v25  ;;  %v846_v1 = vmul.f32 0.6931472, %v1878_v37  ;;  %vm851_vm6 = vcmp.lt.f32.partialorder %v850_v11, 0.0004427343  ;;  %vm2577_vm7 = vcmp.lt.f32.partialorder %v715_v46, 0.0004427343 }
 0x100   : > { %v559_v59 = vmin.f32 %v2561_v18, 20.0  ;;  %v2574_v62 = vmul.f32 100.0, %v2564_v48  ;;  %v1882_v4 = vpop.eup %1881  ;;  %1653 = vmatmul.msk.f32.gmra.mxu1 %vm290_vm0, %v988_v50  ;;  %1885 = vlog2.f32 %v853_v29  ;;  %v856_v8 = vmul.f32 -0.5, %v2544_v32 }
 0x101   : > { %v852_v35 = vsel %vm851_vm6, %v849_v23, %v846_v1  ;;  %v711_v26 = vmul.f32 0.6931472, %v1882_v4  ;;  %1887 = vpow2.f32 %v586_v54  ;;  %v718_v63 = vadd.f32 1.0, %v1880_v52 }
 0x102   : > { %v618_v6 = vmul.f32 1.442695, %v559_v59  ;;  %v544_v2 = vmin.f32 %v2574_v62, 20.0  ;;  %v940_v12 = vmul.f32 0.01, %v852_v35  ;;  %v857_v13 = vadd.f32 1.0, %v856_v8 }
 0x103   : > { %v488_v42 = vpop.f32.mrf.mxu2  ;;  %v2583_v53 = vpop.eup %1883  ;;  %v717_v7 = vsel %vm2577_vm7, %v714_v16, %v711_v26  ;;  %vm957_vm8 = vcmp.gt.f32.partialorder %v2464_v43, 20.0  ;;  %v859_v57 = vand.u32 2147483647, %v2544_v32  ;;  %v721_v30 = vmul.f32 -0.5, %v1880_v52 }
 0x104   : > { %1889 = vpow2.f32 %v618_v6  ;;  %v2586_v14 = vadd.f32 %v2201_v47, %v488_v42  ;;  %v1004_v61 = vsel %vm972_vm5, %v2442_v56, %v940_v12  ;;  %v925_v19 = vmul.f32 0.01, %v717_v7 }
 0x105   : > { %v443_v20 = vpop.f32.mrf.mxu0  ;;  %1891 = vlog2.f32 %v718_v63  ;;  %v588_v55 = vmul.f32 1.442695, %v544_v2  ;;  %1669 = vmatmul.msk.f32.gmra.mxu3 %vm290_vm0, %v1004_v61  ;;  %v858_v56 = vmul.f32 %v2544_v32, %v857_v13  ;;  %v724_v3 = vand.u32 2147483647, %v1880_v52 }
 0x106   : > { %v2597_v51 = vmul.f32 100.0, %v2586_v14  ;;  %v2600_v24 = vadd.f32 %v2201_v47, %v443_v20  ;;  %v1886_v43 = vpop.eup %1885  ;;  %v989_v17 = vsel %vm957_vm8, %v2455_v5, %v925_v19  ;;  %v862_v31 = vadd.f32 1.0, %v2583_v53 }
 0x107   : > { %v855_v36 = vmul.f32 0.6931472, %v1886_v43  ;;  %v722_v39 = vadd.f32 1.0, %v721_v30  ;;  %v1888_v58 = vpop.eup %1887  ;;  %vm860_vm9 = vcmp.lt.f32.partialorder %v859_v57, 0.0004427343  ;;  %vm973_vm10 = vcmp.gt.f32.partialorder %v2487_v44, 20.0 }
 0x108   : > { %v560_v9 = vmin.f32 %v2597_v51, 20.0  ;;  %v2607_v0 = vmul.f32 100.0, %v2600_v24  ;;  %1654 = vmatmul.msk.f32.gmra.mxu1 %vm290_vm0, %v989_v17  ;;  %1893 = vlog2.f32 %v862_v31  ;;  %v865_v5 = vmul.f32 -0.5, %v2583_v53 }
 0x109   : > { %v861_v11 = vsel %vm860_vm9, %v858_v56, %v855_v36  ;;  %v723_v15 = vmul.f32 %v1880_v52, %v722_v39  ;;  %1895 = vpow2.f32 %v588_v55  ;;  %vm2615_vm11 = vcmp.lt.f32.partialorder %v724_v3, 0.0004427343 }
 0x10a   : > { %v2612_v32 = vpop.eup %1889  ;;  %v620_v60 = vmul.f32 1.442695, %v560_v9  ;;  %v545_v40 = vmin.f32 %v2607_v0, 20.0  ;;  %v941_v28 = vmul.f32 0.01, %v861_v11  ;;  %v866_v37 = vadd.f32 1.0, %v865_v5 }
 0x10b   : > { %v1892_v21 = vpop.eup %1891  ;;  %v491_v46 = vpop.f32.mrf.mxu2  ;;  %vm958_vm12 = vcmp.gt.f32.partialorder %v2504_v27, 20.0  ;;  %v868_v16 = vand.u32 2147483647, %v2583_v53  ;;  %v727_v50 = vadd.f32 1.0, %v1888_v58  ;;  %v730_v1 = vmul.f32 -0.5, %v1888_v58 }
 0x10c   : > { %v2620_v54 = vadd.f32 %v2201_v47, %v491_v46  ;;  %v720_v23 = vmul.f32 0.6931472, %v1892_v21  ;;  %v590_v29 = vmul.f32 1.442695, %v545_v40  ;;  %v1005_v52 = vsel %vm973_vm10, %v2482_v33, %v941_v28  ;;  %v1931_v27 = vld [vmem:[%s3018_s2] ss:$0 sm:$0xff] }
 0x10d   : > { %v446_v59 = vpop.f32.mrf.mxu0  ;;  %1897 = vpow2.f32 %v620_v60  ;;  %1670 = vmatmul.msk.f32.gmra.mxu3 %vm290_vm0, %v1005_v52  ;;  %v867_v44 = vmul.f32 %v2583_v53, %v866_v37  ;;  %v731_v33 = vadd.f32 1.0, %v730_v1  ;;  %v733_v42 = vand.u32 2147483647, %v1888_v58 }
 0x10e   : > { %v2629_v4 = vmul.f32 100.0, %v2620_v54  ;;  %v726_v34 = vsel %vm2615_vm11, %v723_v15, %v720_v23  ;;  %v2634_v8 = vadd.f32 %v2201_v47, %v446_v59  ;;  %v1894_v6 = vpop.eup %1893  ;;  %1899 = vlog2.f32 %v727_v50 }
 0x10f   : > { %v926_v2 = vmul.f32 0.01, %v726_v34  ;;  %v864_v12 = vmul.f32 0.6931472, %v1894_v6  ;;  %v2641_v13 = vpop.eup %1895  ;;  %1901 = vpow2.f32 %v590_v29  ;;  %vm869_vm13 = vcmp.lt.f32.partialorder %v868_v16, 0.0004427343 }
 0x110   : > { %v561_v35 = vmin.f32 %v2629_v4, 20.0  ;;  %v2639_v26 = vmul.f32 100.0, %v2634_v8  ;;  %v871_v63 = vadd.f32 1.0, %v2612_v32  ;;  %v874_v19 = vmul.f32 -0.5, %v2612_v32 }
 0x111   : > { %v990_v47 = vsel %vm958_vm12, %v2490_v45, %v926_v2  ;;  %v870_v61 = vsel %vm869_vm13, %v867_v44, %v864_v12  ;;  %vm974_vm14 = vcmp.gt.f32.partialorder %v2524_v38, 20.0  ;;  %v732_v55 = vmul.f32 %v1888_v58, %v731_v33 }
 0x112   : > { %v622_v53 = vmul.f32 1.442695, %v561_v35  ;;  %1655 = vmatmul.msk.f32.gmra.mxu1 %vm290_vm0, %v990_v47  ;;  %v546_v7 = vmin.f32 %v2639_v26, 20.0  ;;  %v942_v20 = vmul.f32 0.01, %v870_v61  ;;  %1903 = vlog2.f32 %v871_v63 }
 0x113   : > { %v494_v57 = vpop.f32.mrf.mxu2  ;;  %v2651_v30 = vpop.eup %1897  ;;  %vm2658_vm15 = vcmp.lt.f32.partialorder %v733_v42, 0.0004427343  ;;  %v875_v31 = vadd.f32 1.0, %v874_v19  ;;  %v736_v9 = vadd.f32 1.0, %v2641_v13  ;;  %v739_v36 = vmul.f32 -0.5, %v2641_v13 }
 0x114   : > { %1905 = vpow2.f32 %v622_v53  ;;  %v592_v45 = vmul.f32 1.442695, %v546_v7  ;;  %v2656_v43 = vadd.f32 %v1931_v27, %v494_v57  ;;  %v1900_v56 = vpop.eup %1899  ;;  %v1006_v38 = vsel %vm974_vm14, %v2518_v49, %v942_v20 }
 0x115   : > { %v449_v3 = vpop.f32.mrf.mxu0  ;;  %1671 = vmatmul.msk.f32.gmra.mxu3 %vm290_vm0, %v1006_v38  ;;  %v729_v58 = vmul.f32 0.6931472, %v1900_v56  ;;  %v2671_v60 = vpop.eup %1901  ;;  %vm959_vm1 = vcmp.gt.f32.partialorder %v2535_v22, 20.0  ;;  %v877_v49 = vand.u32 2147483647, %v2612_v32  ;;  %v740_v21 = vadd.f32 1.0, %v739_v36 }
 0x116   : > { %1907 = vpow2.f32 %v592_v45  ;;  %v2667_v39 = vmul.f32 100.0, %v2656_v43  ;;  %v2669_v5 = vadd.f32 %v1931_v27, %v449_v3  ;;  %v876_v25 = vmul.f32 %v2612_v32, %v875_v31 }
 0x117   : > { %1909 = vlog2.f32 %v736_v9  ;;  %v735_v11 = vsel %vm2658_vm15, %v732_v55, %v729_v58  ;;  %v742_v37 = vand.u32 2147483647, %v2641_v13  ;;  %v880_v23 = vadd.f32 1.0, %v2651_v30 }
 0x118   : > { %v562_v40 = vmin.f32 %v2667_v39, 20.0  ;;  %v2679_v15 = vmul.f32 100.0, %v2669_v5  ;;  %v1904_v28 = vpop.eup %1903  ;;  %v927_v46 = vmul.f32 0.01, %v735_v11  ;;  %v883_v50 = vmul.f32 -0.5, %v2651_v30 }
 0x119   : > { %v873_v59 = vmul.f32 0.6931472, %v1904_v28  ;;  %vm878_vm2 = vcmp.lt.f32.partialorder %v877_v49, 0.0004427343  ;;  %vm975_vm3 = vcmp.gt.f32.partialorder %v2561_v18, 20.0  ;;  %1911 = vlog2.f32 %v880_v23 }
 0x11a   : > { %v2684_v16 = vpop.eup %1905  ;;  %v624_v29 = vmul.f32 1.442695, %v562_v40  ;;  %v547_v52 = vmin.f32 %v2679_v15, 20.0  ;;  %v991_v1 = vsel %vm959_vm1, %v2528_v10, %v927_v46  ;;  %v741_v33 = vmul.f32 %v2641_v13, %v740_v21 }
 0x11b   : > { %v497_v32 = vpop.f32.mrf.mxu2  ;;  %1656 = vmatmul.msk.f32.gmra.mxu1 %vm290_vm0, %v991_v1  ;;  %v879_v2 = vsel %vm878_vm2, %v876_v25, %v873_v59  ;;  %vm2698_vm4 = vcmp.lt.f32.partialorder %v742_v37, 0.0004427343  ;;  %v745_v22 = vadd.f32 1.0, %v2671_v60  ;;  %v884_v63 = vadd.f32 1.0, %v883_v50 }
 0x11c   : > { %v2692_v34 = vpop.eup %1907  ;;  %v594_v6 = vmul.f32 1.442695, %v547_v52  ;;  %v2695_v44 = vadd.f32 %v1931_v27, %v497_v32  ;;  %1913 = vpow2.f32 %v624_v29  ;;  %v943_v12 = vmul.f32 0.01, %v879_v2 }
 0x11d   : > { %v1910_v35 = vpop.eup %1909  ;;  %v748_v53 = vmul.f32 -0.5, %v2671_v60  ;;  %v886_v7 = vand.u32 2147483647, %v2651_v30  ;;  %1915 = vlog2.f32 %v745_v22  ;;  %v751_v61 = vand.u32 2147483647, %v2671_v60 }
 0x11e   : > { %v2704_v42 = vmul.f32 100.0, %v2695_v44  ;;  %v738_v47 = vmul.f32 0.6931472, %v1910_v35  ;;  %v1007_v13 = vsel %vm975_vm3, %v2551_v41, %v943_v12  ;;  %1917 = vpow2.f32 %v594_v6 }
 0x11f   : > { %1672 = vmatmul.msk.f32.gmra.mxu3 %vm290_vm0, %v1007_v13  ;;  %v749_v57 = vadd.f32 1.0, %v748_v53  ;;  %v1912_v55 = vpop.eup %1911  ;;  %vm960_vm5 = vcmp.gt.f32.partialorder %v2574_v62, 20.0  ;;  %v889_v41 = vadd.f32 1.0, %v2684_v16  ;;  %v892_v18 = vmul.f32 -0.5, %v2684_v16 }
 0x120   : > { %v563_v19 = vmin.f32 %v2704_v42, 20.0  ;;  %v744_v20 = vsel %vm2698_vm4, %v741_v33, %v738_v47  ;;  %v882_v17 = vmul.f32 0.6931472, %v1912_v55  ;;  %v885_v56 = vmul.f32 %v2651_v30, %v884_v63 }
 0x121   : > { %v928_v45 = vmul.f32 0.01, %v744_v20  ;;  %vm976_vm6 = vcmp.gt.f32.partialorder %v2597_v51, 20.0  ;;  %vm887_vm7 = vcmp.lt.f32.partialorder %v886_v7, 0.0004427343  ;;  %1919 = vlog2.f32 %v889_v41 }
 0x122   : > { %v626_v27 = vmul.f32 1.442695, %v563_v19  ;;  %v1914_v38 = vpop.eup %1913  ;;  %vm2722_vm8 = vcmp.lt.f32.partialorder %v751_v61, 0.0004427343  ;;  %v888_v62 = vsel %vm887_vm7, %v885_v56, %v882_v17  ;;  %v750_v9 = vmul.f32 %v2671_v60, %v749_v57 }
 0x123   : > { %v992_v3 = vsel %vm960_vm5, %v2564_v48, %v928_v45  ;;  %v754_v36 = vadd.f32 1.0, %v2692_v34  ;;  %v1916_v30 = vpop.eup %1915  ;;  %v944_v58 = vmul.f32 0.01, %v888_v62  ;;  %v893_v49 = vadd.f32 1.0, %v892_v18 }
 0x124   : > { %1921 = vpow2.f32 %v626_v27  ;;  %1657 = vmatmul.msk.f32.gmra.mxu1 %vm290_vm0, %v992_v3  ;;  %v895_v40 = vand.u32 2147483647, %v2684_v16  ;;  %v757_v48 = vmul.f32 -0.5, %v2692_v34  ;;  %v1918_v11 = vpop.eup %1917  ;;  %v747_v21 = vmul.f32 0.6931472, %v1916_v30 }
 0x125   : > { %1923 = vlog2.f32 %v754_v36  ;;  %v760_v28 = vand.u32 2147483647, %v2692_v34  ;;  %v898_v46 = vadd.f32 1.0, %v1914_v38  ;;  %v1008_v25 = vsel %vm976_vm6, %v2586_v14, %v944_v58 }
 0x126   : > { %v758_v60 = vadd.f32 1.0, %v757_v48  ;;  %v901_v37 = vmul.f32 -0.5, %v1914_v38  ;;  %v753_v23 = vsel %vm2722_vm8, %v750_v9, %v747_v21  ;;  %vm961_vm9 = vcmp.gt.f32.partialorder %v2607_v0, 20.0 }
 0x127   : > { %1673 = vmatmul.msk.f32.gmra.mxu3 %vm290_vm0, %v1008_v25  ;;  %1925 = vlog2.f32 %v898_v46  ;;  %v1920_v29 = vpop.eup %1919  ;;  %v929_v52 = vmul.f32 0.01, %v753_v23  ;;  %vm2739_vm10 = vcmp.lt.f32.partialorder %v895_v40, 0.0004427343  ;;  %v763_v50 = vadd.f32 1.0, %v1918_v11 }
 0x128   : > { %v891_v51 = vmul.f32 0.6931472, %v1920_v29  ;;  %v894_v14 = vmul.f32 %v2684_v16, %v893_v49  ;;  %vm2744_vm11 = vcmp.lt.f32.partialorder %v760_v28, 0.0004427343  ;;  %v766_v6 = vmul.f32 -0.5, %v1918_v11 }
 0x129   : > { %v993_v2 = vsel %vm961_vm9, %v2600_v24, %v929_v52  ;;  %v759_v33 = vmul.f32 %v2692_v34, %v758_v60  ;;  %v902_v35 = vadd.f32 1.0, %v901_v37  ;;  %1927 = vlog2.f32 %v763_v50 }
 0x12a   : > { %v1922_v1 = vpop.eup %1921  ;;  %v897_v12 = vsel %vm2739_vm10, %v894_v14, %v891_v51  ;;  %v904_v10 = vand.u32 2147483647, %v1914_v38  ;;  %v767_v22 = vadd.f32 1.0, %v766_v6  ;;  %v769_v53 = vand.u32 2147483647, %v1918_v11 }
 0x12b   : > { %v1924_v0 = vpop.eup %1923  ;;  %v907_v16 = vadd.f32 1.0, %v1922_v1  ;;  %v945_v47 = vmul.f32 0.01, %v897_v12  ;;  %vm977_vm12 = vcmp.gt.f32.partialorder %v2629_v4, 20.0  ;;  %v910_v24 = vmul.f32 -0.5, %v1922_v1 }
 0x12c   : > { %1658 = vmatmul.msk.f32.gmra.mxu1 %vm290_vm0, %v993_v2  ;;  %v756_v63 = vmul.f32 0.6931472, %v1924_v0  ;;  %v903_v19 = vmul.f32 %v1914_v38, %v902_v35  ;;  %vm905_vm13 = vcmp.lt.f32.partialorder %v904_v10, 0.0004427343  ;;  %v768_v57 = vmul.f32 %v1918_v11, %v767_v22 }
 0x12d   : > { %v1926_v13 = vpop.eup %1925  ;;  %1929 = vlog2.f32 %v907_v16  ;;  %v1009_v34 = vsel %vm977_vm12, %v2620_v54, %v945_v47  ;;  %vm962_vm14 = vcmp.gt.f32.partialorder %v2639_v26, 20.0  ;;  %vm770_vm15 = vcmp.lt.f32.partialorder %v769_v53, 0.0004427343 }
 0x12e   : > { %v762_v7 = vsel %vm2744_vm11, %v759_v33, %v756_v63  ;;  %v900_v61 = vmul.f32 0.6931472, %v1926_v13  ;;  %v911_v4 = vadd.f32 1.0, %v910_v24  ;;  %v913_v27 = vand.u32 2147483647, %v1922_v1 }
 0x12f   : > { %1674 = vmatmul.msk.f32.gmra.mxu3 %vm290_vm0, %v1009_v34  ;;  %v930_v20 = vmul.f32 0.01, %v762_v7  ;;  %v1928_v55 = vpop.eup %1927  ;;  %vm978_vm1 = vcmp.gt.f32.partialorder %v2667_v39, 20.0  ;;  %vm963_vm3 = vcmp.gt.f32.partialorder %v2679_v15, 20.0  ;;  %vm1233_vm4 = vcmask 261120  }
 0x130   : > { %v906_v45 = vsel %vm905_vm13, %v903_v19, %v900_v61  ;;  %v765_v18 = vmul.f32 0.6931472, %v1928_v55  ;;  %v912_v26 = vmul.f32 %v1922_v1, %v911_v4  ;;  %vm914_vm2 = vcmp.lt.f32.partialorder %v913_v27, 0.0004427343 }
 0x131   : > { %v994_v41 = vsel %vm962_vm14, %v2634_v8, %v930_v20  ;;  %v946_v54 = vmul.f32 0.01, %v906_v45  ;;  %v2767_v8 = vld [vmem:[%s3020_s4] ss:$0 sm:$0xff]  ;;  %vm979_vm5 = vcmp.gt.f32.partialorder %v2704_v42, 20.0 }
 0x132   : > { %v771_v56 = vsel %vm770_vm15, %v768_v57, %v765_v18 }
 0x133   : > { %v1930_v17 = vpop.eup %1929  ;;  %v1010_v38 = vsel %vm978_vm1, %v2656_v43, %v946_v54  ;;  %v931_v3 = vmul.f32 0.01, %v771_v56 }
 0x134   : > { %1659 = vmatmul.msk.f32.gmra.mxu1 %vm290_vm0, %v994_v41  ;;  %v909_v31 = vmul.f32 0.6931472, %v1930_v17 }
 0x135   : > { %v995_v39 = vsel %vm963_vm3, %v2669_v5, %v931_v3 }
 0x136   : > { %v915_v62 = vsel %vm914_vm2, %v912_v26, %v909_v31 }
 0x137   : > { %1675 = vmatmul.msk.f32.gmra.mxu3 %vm290_vm0, %v1010_v38  ;;  %v947_v43 = vmul.f32 0.01, %v915_v62 }
 0x139   : > { %v1137_v9 = vpop.f32.mrf.mxu1  ;;  %v1011_v5 = vsel %vm979_vm5, %v2695_v44, %v947_v43 }
 0x13a   : > { %v1138_v36 = vadd.f32 %v2767_v8, %v1137_v9 }
 0x13c   : > { %1660 = vmatmul.msk.f32.gmra.mxu1 %vm290_vm0, %v995_v39  ;;  %1234 = vst.msk [vmem:[%s2774_s18] sm:$0xff] %vm1233_vm4, %v1138_v36 }
 0x13f   : > { %1676 = vmatmul.msk.f32.gmra.mxu3 %vm290_vm0, %v1011_v5 }
 0x142   : > { %v1140_v15 = vpop.f32.mrf.mxu1 }
 0x143   : > { %v1141_v30 = vadd.f32 %v2767_v8, %v1140_v15 }
 0x145   : > { %1235 = vst.msk [vmem:[%s2774_s18 + $0x8] sm:$0xff] %vm1233_vm4, %v1141_v30  ;;  %v1185_v58 = vpop.f32.mrf.mxu3 }
 0x146   : > { %v1186_v49 = vadd.f32 %v2767_v8, %v1185_v58 }
 0x148   : > { %1250 = vst.msk [vmem:[%s2774_s18 + $0x80] sm:$0xff] %vm1233_vm4, %v1186_v49 }
 0x14a   : > { %v1143_v40 = vpop.f32.mrf.mxu1 }
 0x14b   : > { %v1144_v42 = vadd.f32 %v2767_v8, %v1143_v40 }
 0x14d   : > { %1236 = vst.msk [vmem:[%s2774_s18 + $0x10] sm:$0xff] %vm1233_vm4, %v1144_v42 }
 0x14e   : > { %v1188_v44 = vpop.f32.mrf.mxu3 }
 0x14f   : > { %v1189_v48 = vadd.f32 %v2767_v8, %v1188_v44 }
 0x151   : > { %1251 = vst.msk [vmem:[%s2774_s18 + $0x88] sm:$0xff] %vm1233_vm4, %v1189_v48 }
 0x153   : > { %v1146_v11 = vpop.f32.mrf.mxu1 }
 0x154   : > { %v1147_v21 = vadd.f32 %v2767_v8, %v1146_v11 }
 0x156   : > { %1237 = vst.msk [vmem:[%s2774_s18 + $0x18] sm:$0xff] %vm1233_vm4, %v1147_v21  ;;  %v1191_v28 = vpop.f32.mrf.mxu3 }
 0x157   : > { %v1192_v46 = vadd.f32 %v2767_v8, %v1191_v28 }
 0x159   : > { %1252 = vst.msk [vmem:[%s2774_s18 + $0x90] sm:$0xff] %vm1233_vm4, %v1192_v46 }
 0x15b   : > { %v1149_v25 = vpop.f32.mrf.mxu1 }
 0x15c   : > { %v1150_v60 = vadd.f32 %v2767_v8, %v1149_v25 }
 0x15e   : > { %1238 = vst.msk [vmem:[%s2774_s18 + $0x20] sm:$0xff] %vm1233_vm4, %v1150_v60  ;;  %v1194_v37 = vpop.f32.mrf.mxu3 }
 0x15f   : > { %v1195_v23 = vadd.f32 %v2767_v8, %v1194_v37 }
 0x161   : > { %1253 = vst.msk [vmem:[%s2774_s18 + $0x98] sm:$0xff] %vm1233_vm4, %v1195_v23 }
 0x163   : > { %v1152_v29 = vpop.f32.mrf.mxu1 }
 0x164   : > { %v1153_v52 = vadd.f32 %v2767_v8, %v1152_v29 }
 0x166   : > { %v1197_v59 = vpop.f32.mrf.mxu3  ;;  %1239 = vst.msk [vmem:[%s2774_s18 + $0x28] sm:$0xff] %vm1233_vm4, %v1153_v52 }
 0x167   : > { %v1198_v50 = vadd.f32 %v2767_v8, %v1197_v59 }
 0x169   : > { %1254 = vst.msk [vmem:[%s2774_s18 + $0xa0] sm:$0xff] %vm1233_vm4, %v1198_v50 }
 0x16b   : > { %v1155_v1 = vpop.f32.mrf.mxu1 }
 0x16c   : > { %v1156_v51 = vadd.f32 %v2767_v8, %v1155_v1 }
 0x16e   : > { %1240 = vst.msk [vmem:[%s2774_s18 + $0x30] sm:$0xff] %vm1233_vm4, %v1156_v51 }
 0x16f   : > { %v1200_v14 = vpop.f32.mrf.mxu3 }
 0x170   : > { %v1201_v32 = vadd.f32 %v2767_v8, %v1200_v14 }
 0x172   : > { %1255 = vst.msk [vmem:[%s2774_s18 + $0xa8] sm:$0xff] %vm1233_vm4, %v1201_v32 }
 0x173   : > { %v1158_v6 = vpop.f32.mrf.mxu1 }
 0x174   : > { %v1159_v2 = vadd.f32 %v2767_v8, %v1158_v6 }
 0x176   : > { %1241 = vst.msk [vmem:[%s2774_s18 + $0x38] sm:$0xff] %vm1233_vm4, %v1159_v2 }
 0x177   : > { %v1203_v33 = vpop.f32.mrf.mxu3 }
 0x178   : > { %v1204_v35 = vadd.f32 %v2767_v8, %v1203_v33 }
 0x17a   : > { %1256 = vst.msk [vmem:[%s2774_s18 + $0xb0] sm:$0xff] %vm1233_vm4, %v1204_v35 }
 0x17d   : > { %v1161_v0 = vpop.f32.mrf.mxu1 }
 0x17e   : > { %v1162_v12 = vadd.f32 %v2767_v8, %v1161_v0 }
 0x17f   : > { %v1206_v10 = vpop.f32.mrf.mxu3 }
 0x180   : > { %1242 = vst.msk [vmem:[%s2774_s18 + $0x40] sm:$0xff] %vm1233_vm4, %v1162_v12  ;;  %v1207_v22 = vadd.f32 %v2767_v8, %v1206_v10 }
 0x182   : > { %1257 = vst.msk [vmem:[%s2774_s18 + $0xb8] sm:$0xff] %vm1233_vm4, %v1207_v22 }
 0x185   : > { %v1164_v16 = vpop.f32.mrf.mxu1 }
 0x186   : > { %v1165_v47 = vadd.f32 %v2767_v8, %v1164_v16 }
 0x188   : > { %1243 = vst.msk [vmem:[%s2774_s18 + $0x48] sm:$0xff] %vm1233_vm4, %v1165_v47  ;;  %v1209_v63 = vpop.f32.mrf.mxu3 }
 0x189   : > { %v1210_v53 = vadd.f32 %v2767_v8, %v1209_v63 }
 0x18b   : > { %1258 = vst.msk [vmem:[%s2774_s18 + $0xc0] sm:$0xff] %vm1233_vm4, %v1210_v53 }
 0x18f   : > { %v1167_v13 = vpop.f32.mrf.mxu1 }
 0x190   : > { %v1168_v24 = vadd.f32 %v2767_v8, %v1167_v13  ;;  %v1212_v34 = vpop.f32.mrf.mxu3 }
 0x191   : > { %v1213_v7 = vadd.f32 %v2767_v8, %v1212_v34 }
 0x192   : > { %1244 = vst.msk [vmem:[%s2774_s18 + $0x50] sm:$0xff] %vm1233_vm4, %v1168_v24 }
 0x193   : > { %1259 = vst.msk [vmem:[%s2774_s18 + $0xc8] sm:$0xff] %vm1233_vm4, %v1213_v7 }
 0x198   : > { %v1170_v61 = vpop.f32.mrf.mxu1  ;;  %v1215_v19 = vpop.f32.mrf.mxu3 }
 0x199   : > { %v1171_v20 = vadd.f32 %v2767_v8, %v1170_v61  ;;  %v1216_v57 = vadd.f32 %v2767_v8, %v1215_v19 }
 0x19b   : > { %1245 = vst.msk [vmem:[%s2774_s18 + $0x58] sm:$0xff] %vm1233_vm4, %v1171_v20 }
 0x19c   : > { %1260 = vst.msk [vmem:[%s2774_s18 + $0xd0] sm:$0xff] %vm1233_vm4, %v1216_v57 }
 0x1a1   : > { %v1173_v55 = vpop.f32.mrf.mxu1 }
 0x1a2   : > { %v1174_v45 = vadd.f32 %v2767_v8, %v1173_v55  ;;  %v1218_v4 = vpop.f32.mrf.mxu3 }
 0x1a3   : > { %v1219_v41 = vadd.f32 %v2767_v8, %v1218_v4 }
 0x1a4   : > { %1246 = vst.msk [vmem:[%s2774_s18 + $0x60] sm:$0xff] %vm1233_vm4, %v1174_v45 }
 0x1a5   : > { %1261 = vst.msk [vmem:[%s2774_s18 + $0xd8] sm:$0xff] %vm1233_vm4, %v1219_v41 }
 0x1a9   : > { %v1176_v54 = vpop.f32.mrf.mxu1 }
 0x1aa   : > { %v1177_v18 = vadd.f32 %v2767_v8, %v1176_v54  ;;  %v1221_v27 = vpop.f32.mrf.mxu3 }
 0x1ab   : > { %v1222_v17 = vadd.f32 %v2767_v8, %v1221_v27 }
 0x1ac   : > { %1247 = vst.msk [vmem:[%s2774_s18 + $0x68] sm:$0xff] %vm1233_vm4, %v1177_v18 }
 0x1ad   : > { %1262 = vst.msk [vmem:[%s2774_s18 + $0xe0] sm:$0xff] %vm1233_vm4, %v1222_v17 }
 0x1b1   : > { %v1179_v56 = vpop.f32.mrf.mxu1 }
 0x1b2   : > { %v1180_v38 = vadd.f32 %v2767_v8, %v1179_v56  ;;  %v1224_v3 = vpop.f32.mrf.mxu3 }
 0x1b3   : > { %v1225_v31 = vadd.f32 %v2767_v8, %v1224_v3 }
 0x1b4   : > { %1248 = vst.msk [vmem:[%s2774_s18 + $0x70] sm:$0xff] %vm1233_vm4, %v1180_v38 }
 0x1b5   : > { %1263 = vst.msk [vmem:[%s2774_s18 + $0xe8] sm:$0xff] %vm1233_vm4, %v1225_v31 }
 0x1b9   : > { %v1182_v26 = vpop.f32.mrf.mxu1 }
 0x1ba   : > { %v1183_v62 = vadd.f32 %v2767_v8, %v1182_v26  ;;  %v1227_v39 = vpop.f32.mrf.mxu3 }
 0x1bb   : > { %v1228_v9 = vadd.f32 %v2767_v8, %v1227_v39 }
 0x1bc   : > { %1249 = vst.msk [vmem:[%s2774_s18 + $0x78] sm:$0xff] %vm1233_vm4, %v1183_v62 }
 0x1bd   : > { %1264 = vst.msk [vmem:[%s2774_s18 + $0xf0] sm:$0xff] %vm1233_vm4, %v1228_v9 }
 0x1c1   : > { %1272 = sbr.rel (!%p2075_p4) target bundleno = 518 (0x206), region = 44 }
 0x1c2   : > { %v1230_v43 = vpop.f32.mrf.mxu3 }
 0x1c3   : > { %v1231_v36 = vadd.f32 %v2767_v8, %v1230_v43 }
 0x1c5   : > { %1265 = vst.msk [vmem:[%s2774_s18 + $0xf8] sm:$0xff] %vm1233_vm4, %v1231_v36 }
 0x1c6   : > { %s3078_s12 = smov (!%p1275_p8, %s1274_s12), 32 }
 0x1c7   : > { %s1679_s17 = sshll.u32 %s3078_s12, 3 }
 0x1c8   : > { %p1682_p9 = scmp.eq.s32.totalorder %s1679_s17, 0 }
 0x1c9   : > { %s2887_s20 = sshrl.u32 (!%p1682_p9), %s3078_s12, 5 }
 0x1ca   : > { %1283 = sbr.rel (%p1682_p9) target bundleno = 518 (0x206), region = 48  ;;  %p1683_p10 = scmp.le.s32.totalorder (!%p1682_p9), %s2887_s20, 0 }
 0x1cf   : > { %1562 = sbr.rel (%p1683_p10) target bundleno = 501 (0x1f5), region = 124  ;;  %s3069_s21 = smov (!%p1683_p10), %s2881_s16 }
 0x1d0   : > { %s3070_s26 = smov (!%p1683_p10), %s2774_s18  ;;  %s2896_s6 = smov (!%p1683_p10), 0  }
 0x1d1   : > { %s2898_s23 = smov (!%p1683_p10), 0  }
 0x1d4 LB: >> { %v1408_v8 = vld [vmem:[%s1994_s26] sm:$0xff]  ;;  %v1410_v5 = vld [vmem:[%s1994_s26 + $0x8] sm:$0xff]  ;;  %v1412_v15 = vld [vmem:[%s1994_s26 + $0x10] sm:$0xff]  ;;  %s1472_s24 = sadd.s32 1, %s1998_s6  ;;  %s1402_s23 = sadd.s32 1, %s2002_s23   ;;  %s2002_s23 = sphi %s2898_s23, %s1402_s23   ;;  %s1998_s6 = sphi %s2896_s6, %s3073_s6   ;;  %s1994_s26 = sphi %s3070_s26, %s3072_s26   ;;  %s1990_s21 = sphi %s3069_s21, %s3071_s21  }
 0x1d5   : >> { %1409 = vst [vmem:[%s1990_s21] sm:$0xff] %v1408_v8  ;;  %v1414_v30 = vld [vmem:[%s1994_s26 + $0x18] sm:$0xff]  ;;  %p1473_p11 = scmp.ge.s32.totalorder %s1472_s24, %s2887_s20  ;;  %v1416_v58 = vld [vmem:[%s1994_s26 + $0x20] sm:$0xff]  ;;  %v1418_v49 = vld [vmem:[%s1994_s26 + $0x28] sm:$0xff]  ;;  %p1401_p12 = scmp.ge.s32.totalorder %s1402_s23, %s2887_s20 }
 0x1d6   : >> { %1411 = vst [vmem:[%s1990_s21 + $0x8] sm:$0xff] %v1410_v5  ;;  %v1420_v40 = vld [vmem:[%s1994_s26 + $0x30] sm:$0xff]  ;;  %v1422_v42 = vld [vmem:[%s1994_s26 + $0x38] sm:$0xff]  ;;  %v1424_v44 = vld [vmem:[%s1994_s26 + $0x40] sm:$0xff] }
 0x1d7   : >> { %1413 = vst [vmem:[%s1990_s21 + $0x10] sm:$0xff] %v1412_v15  ;;  %s3080_s24 = smov (%p1473_p11, %s1472_s24), 0  ;;  %v1426_v48 = vld [vmem:[%s1994_s26 + $0x48] sm:$0xff]  ;;  %v1428_v11 = vld [vmem:[%s1994_s26 + $0x50] sm:$0xff]  ;;  %v1430_v21 = vld [vmem:[%s1994_s26 + $0x58] sm:$0xff] }
 0x1d8   : >> { %1415 = vst [vmem:[%s1990_s21 + $0x18] sm:$0xff] %v1414_v30  ;;  %s1684_s27 = sshll.u32 %s3080_s24, 8  ;;  %v1432_v28 = vld [vmem:[%s1994_s26 + $0x60] sm:$0xff]  ;;  %v1434_v46 = vld [vmem:[%s1994_s26 + $0x68] sm:$0xff]  ;;  %v1436_v25 = vld [vmem:[%s1994_s26 + $0x70] sm:$0xff]  ;;  %s3073_s6 = smov %s3080_s24 }
 0x1d9   : >> { %1417 = vst [vmem:[%s1990_s21 + $0x20] sm:$0xff] %v1416_v58  ;;  %s2930_s28 = scalar_lea.vmem %s2774_s18, %s1684_s27 [#allocation2]   ;;  %s2933_s29 = scalar_lea.vmem %s2881_s16, %s1684_s27   ;;  %v1438_v60 = vld [vmem:[%s1994_s26 + $0x78] sm:$0xff]  ;;  %v1440_v37 = vld [vmem:[%s1994_s26 + $0x80] sm:$0xff]  ;;  %v1442_v23 = vld [vmem:[%s1994_s26 + $0x88] sm:$0xff] }
 0x1da   : >> { %1419 = vst [vmem:[%s1990_s21 + $0x28] sm:$0xff] %v1418_v49  ;;  %v1444_v29 = vld [vmem:[%s1994_s26 + $0x90] sm:$0xff]  ;;  %v1446_v52 = vld [vmem:[%s1994_s26 + $0x98] sm:$0xff]  ;;  %v1448_v59 = vld [vmem:[%s1994_s26 + $0xa0] sm:$0xff] }
 0x1db   : >> { %1421 = vst [vmem:[%s1990_s21 + $0x30] sm:$0xff] %v1420_v40  ;;  %v1450_v50 = vld [vmem:[%s1994_s26 + $0xa8] sm:$0xff]  ;;  %v1452_v1 = vld [vmem:[%s1994_s26 + $0xb0] sm:$0xff]  ;;  %v1454_v51 = vld [vmem:[%s1994_s26 + $0xb8] sm:$0xff] }
 0x1dc   : >> { %1423 = vst [vmem:[%s1990_s21 + $0x38] sm:$0xff] %v1422_v42  ;;  %v1456_v14 = vld [vmem:[%s1994_s26 + $0xc0] sm:$0xff]  ;;  %v1458_v32 = vld [vmem:[%s1994_s26 + $0xc8] sm:$0xff]  ;;  %v1460_v6 = vld [vmem:[%s1994_s26 + $0xd0] sm:$0xff] }
 0x1dd   : >> { %1425 = vst [vmem:[%s1990_s21 + $0x40] sm:$0xff] %v1424_v44  ;;  %v1462_v2 = vld [vmem:[%s1994_s26 + $0xd8] sm:$0xff]  ;;  %v1464_v33 = vld [vmem:[%s1994_s26 + $0xe0] sm:$0xff]  ;;  %v1466_v35 = vld [vmem:[%s1994_s26 + $0xe8] sm:$0xff] }
 0x1de   : >> { %1427 = vst [vmem:[%s1990_s21 + $0x48] sm:$0xff] %v1426_v48  ;;  %v1468_v0 = vld [vmem:[%s1994_s26 + $0xf0] sm:$0xff]  ;;  %v1470_v12 = vld [vmem:[%s1994_s26 + $0xf8] sm:$0xff]  ;;  %s3072_s26 = smov %s2930_s28 }
 0x1df   : >> { %1429 = vst [vmem:[%s1990_s21 + $0x50] sm:$0xff] %v1428_v11 }
 0x1e0   : >> { %1431 = vst [vmem:[%s1990_s21 + $0x58] sm:$0xff] %v1430_v21 }
 0x1e1   : >> { %1433 = vst [vmem:[%s1990_s21 + $0x60] sm:$0xff] %v1432_v28 }
 0x1e2   : >> { %1435 = vst [vmem:[%s1990_s21 + $0x68] sm:$0xff] %v1434_v46 }
 0x1e3   : >> { %1437 = vst [vmem:[%s1990_s21 + $0x70] sm:$0xff] %v1436_v25 }
 0x1e4   : >> { %1439 = vst [vmem:[%s1990_s21 + $0x78] sm:$0xff] %v1438_v60 }
 0x1e5   : >> { %1441 = vst [vmem:[%s1990_s21 + $0x80] sm:$0xff] %v1440_v37 }
 0x1e6   : >> { %1443 = vst [vmem:[%s1990_s21 + $0x88] sm:$0xff] %v1442_v23 }
 0x1e7   : >> { %1445 = vst [vmem:[%s1990_s21 + $0x90] sm:$0xff] %v1444_v29 }
 0x1e8   : >> { %1447 = vst [vmem:[%s1990_s21 + $0x98] sm:$0xff] %v1446_v52 }
 0x1e9   : >> { %1449 = vst [vmem:[%s1990_s21 + $0xa0] sm:$0xff] %v1448_v59 }
 0x1ea   : >> { %1451 = vst [vmem:[%s1990_s21 + $0xa8] sm:$0xff] %v1450_v50 }
 0x1eb   : >> { %1453 = vst [vmem:[%s1990_s21 + $0xb0] sm:$0xff] %v1452_v1 }
 0x1ec   : >> { %1455 = vst [vmem:[%s1990_s21 + $0xb8] sm:$0xff] %v1454_v51 }
 0x1ed   : >> { %1457 = vst [vmem:[%s1990_s21 + $0xc0] sm:$0xff] %v1456_v14 }
 0x1ee   : >> { %1459 = vst [vmem:[%s1990_s21 + $0xc8] sm:$0xff] %v1458_v32 }
 0x1ef   : >> { %1461 = vst [vmem:[%s1990_s21 + $0xd0] sm:$0xff] %v1460_v6 }
 0x1f0   : >> { %1463 = vst [vmem:[%s1990_s21 + $0xd8] sm:$0xff] %v1462_v2  ;;  %1404 = sbr.rel (!%p1401_p12) target bundleno = 468 (0x1d4), region = 130 }
 0x1f1   : >> { %1465 = vst [vmem:[%s1990_s21 + $0xe0] sm:$0xff] %v1464_v33 }
 0x1f2   : >> { %1467 = vst [vmem:[%s1990_s21 + $0xe8] sm:$0xff] %v1466_v35 }
 0x1f3   : >> { %1469 = vst [vmem:[%s1990_s21 + $0xf0] sm:$0xff] %v1468_v0 }
 0x1f4   : >> { %1471 = vst [vmem:[%s1990_s21 + $0xf8] sm:$0xff] %v1470_v12  ;;  %s3071_s21 = smov %s2933_s29 }
 0x1f5 PF: > { %s2998_s30 = sand.u32 31, %s3078_s12   ;;  %s1695_s7 = sshll.u32 %s2887_s20, 8 }
 0x1f6   : > { %s1483_s8 = scalar_lea.vmem %s2774_s18, %s1695_s7 [#allocation2]   ;;  %s1485_s9 = scalar_lea.vmem %s2881_s16, %s1695_s7  }
 0x1f7   : > { %p1689_p13 = scmp.le.s32.totalorder %s2998_s30, 0 }
 0x1f8   : > { %s2004_s10 = smov (!%p1689_p13), %s1485_s9   ;;  %s2008_s11 = smov (!%p1689_p13), %s1483_s8  }
 0x1f9   : > { %1576 = sbr.rel (%p1689_p13) target bundleno = 518 (0x206), region = 135  ;;  %s2012_s13 = smov (!%p1689_p13), 0  }
 0x1fa   : > { %s2016_s14 = smov (!%p1689_p13), 0  }
 0x1fe LB: >> { %v1495_v10 = vld [vmem:[%s2010_s11] sm:$0xff]  ;;  %s1497_s12 = sadd.s32 1, %s2014_s13  ;;  %s1489_s14 = sadd.s32 1, %s2018_s14   ;;  %s2018_s14 = sphi %s2016_s14, %s1489_s14   ;;  %s2014_s13 = sphi %s2012_s13, %s2013_s13   ;;  %s2010_s11 = sphi %s2008_s11, %s1502_s11   ;;  %s2006_s10 = sphi %s2004_s10, %s1503_s10  }
 0x1ff   : >> { %1496 = vst [vmem:[%s2006_s10] sm:$0xff] %v1495_v10  ;;  %p1498_p0 = scmp.ge.s32.totalorder %s1497_s12, %s2998_s30  ;;  %p1488_p1 = scmp.ge.s32.totalorder %s1489_s14, %s2998_s30 }
 0x201   : >> { %s3082_s12 = smov (%p1498_p0, %s1497_s12), 0  ;;  %1491 = sbr.rel (!%p1488_p1) target bundleno = 510 (0x1fe), region = 141 }
 0x202   : >> { %s1690_s18 = sshll.u32 %s3082_s12, 3  ;;  %s2013_s13 = smov %s3082_s12  }
 0x203   : >> { %s1502_s11 = scalar_lea.vmem %s1483_s8, %s1690_s18 [#allocation2]   ;;  %s1503_s10 = scalar_lea.vmem %s1485_s9, %s1690_s18  }
 0x206 PF: > { %p12_p2 = scmp.ge.s32.totalorder %s2065_s22, 7   ;;  %s3074_s18 = smov %s1982_s19 }
 0x207   : > { %s3075_s19 = smov %s2073_s25  ;;  %s3076_s20 = smov %s2065_s22 }
 0x208   :  { %14 = sbr.rel (!%p12_p2) target bundleno = 2 (0x2), region = 152 }

</bundles_post_ra>
